<compile_context>
chip_gen: v5e
topology: v5e:2x2
jax: 0.10.0
libtpu: 0.0.40
codegen_flags: <defaults>
</compile_context>

<pallas_src>
import functools

import jax
import jax.numpy as jnp
from jax.experimental import pallas as pl
from jax.experimental.pallas import tpu as pltpu

_LANE = 128
_SUBLANE_BF16 = 16


def _round_up(x, m):
    return ((x + m - 1) // m) * m


def _is_v7x():
    try:
        return "v7" in jax.devices()[0].device_kind.lower()
    except Exception:
        return False


@functools.lru_cache(maxsize=None)
def _buffered_weights_supported():
    """Probe once whether BlockSpec(pipeline_mode=pl.Buffered(1)) compiles."""
    if not hasattr(pl, "Buffered"):
        return False
    try:
        def k(x_ref, w_ref, o_ref):
            o_ref[...] = x_ref[...] + w_ref[...]

        f = pl.pallas_call(
            k,
            out_shape=jax.ShapeDtypeStruct((8, 128), jnp.float32),
            grid=(1,),
            in_specs=[
                pl.BlockSpec((8, 128), lambda i: (0, 0)),
                pl.BlockSpec((8, 128), lambda i: (0, 0),
                             pipeline_mode=pl.Buffered(1)),
            ],
            out_specs=pl.BlockSpec((8, 128), lambda i: (0, 0)),
        )
        out = f(jnp.zeros((8, 128), jnp.float32),
                jnp.zeros((8, 128), jnp.float32))
        jax.block_until_ready(out)
        return True
    except Exception:
        return False


def _resident_spec(shape):
    """BlockSpec for a grid-invariant (weight/bias) input; single-buffered
    when the installed Pallas supports pipeline_mode=pl.Buffered(1)."""
    idx = lambda i: (0,) * len(shape)
    if _buffered_weights_supported():
        try:
            return pl.BlockSpec(shape, idx, pipeline_mode=pl.Buffered(1))
        except TypeError:
            pass
    return pl.BlockSpec(shape, idx)


def _choose_tile(batch, *, max_tile=256):
    """Batch tile: as large as possible (fills the MXU M dimension, fewer
    ~0.35us grid steps).  Only on v7x do we force >= 2 grid steps (16-row
    aligned for bf16 sublane packing) so megacore can shard the 'parallel'
    axis; v5e/v6e have one TensorCore and the grid is a serial loop."""
    if batch <= max_tile:
        if _is_v7x() and batch >= 2 * _SUBLANE_BF16:
            return _round_up(pl.cdiv(batch, 2), _SUBLANE_BF16)
        return batch                       # block == full array dim: always legal
    return max_tile                        # multiple of 16; ragged tail handled


def _vmem_limit(tile_b, Dp, H1, Ep, n_branches):
    """Explicit scoped-VMEM limit from the actual footprint (with headroom)."""
    w = Dp * H1 * 2 + H1 * 4 + H1 * Ep * 2 + Ep * 4      # bf16 weights, f32 biases
    x = n_branches * 2 * tile_b * Dp * 4                 # f32 act tiles, double-buffered
    o = n_branches * 2 * tile_b * Ep * 2                 # bf16 out tiles, double-buffered
    tmp = n_branches * tile_b * (H1 + Ep) * 4            # f32 intermediates
    est = 2 * w + x + o + tmp                            # 2*w covers non-Buffered(1) path
    return int(max(32 << 20, min(64 << 20, 4 * est)))


# ----------------------------------------------------------------------------
# Kernel bodies: fused 2-layer MLP  (x @ W1 + b1) -> ReLU -> (@ W2 + b2)
#   x arrives f32 and is cast to bf16 in-kernel (MXU-native); accumulation and
#   bias/ReLU stay f32 (v5e VPU has no bf16 elementwise); output stored bf16.
# ----------------------------------------------------------------------------
def _branch(x_f32, w1, b1, w2, b2, out_dtype):
    x = x_f32.astype(jnp.bfloat16)                       # in-kernel cast
    h = jnp.dot(x, w1, preferred_element_type=jnp.float32)
    h = jnp.maximum(h + b1, 0.0)                         # f32 bias + ReLU
    o = jnp.dot(h.astype(jnp.bfloat16), w2, preferred_element_type=jnp.float32)
    return (o + b2).astype(out_dtype)


def _siamese_kernel(x1_ref, x2_ref, w1_ref, b1_ref, w2_ref, b2_ref,
                    o1_ref, o2_ref):
    w1 = w1_ref[...]
    b1 = b1_ref[...]
    w2 = w2_ref[...]
    b2 = b2_ref[...]
    o1_ref[...] = _branch(x1_ref[...], w1, b1, w2, b2, o1_ref.dtype)
    o2_ref[...] = _branch(x2_ref[...], w1, b1, w2, b2, o2_ref.dtype)


def _embed_kernel(x_ref, w1_ref, b1_ref, w2_ref, b2_ref, o_ref):
    o_ref[...] = _branch(x_ref[...], w1_ref[...], b1_ref[...],
                         w2_ref[...], b2_ref[...], o_ref.dtype)


# ----------------------------------------------------------------------------
# pallas_call builder: n shared-weight branches in ONE launch
# ----------------------------------------------------------------------------
def _mlp_call(xs, params, tile_b):
    """xs: tuple of [B, Dp] f32 inputs sharing one weight set.
    Returns a tuple of [B, Ep] bf16 lane-dense outputs (one per input)."""
    w1, b1, w2p, b2p = params
    Dp, H1 = w1.shape
    Ep = w2p.shape[1]
    B = xs[0].shape[0]
    n = len(xs)

    x_spec = pl.BlockSpec((tile_b, Dp), lambda i: (i, 0))
    o_spec = pl.BlockSpec((tile_b, Ep), lambda i: (i, 0))      # lane-dense store
    kernel = _siamese_kernel if n == 2 else _embed_kernel

    return pl.pallas_call(
        kernel,
        out_shape=tuple(jax.ShapeDtypeStruct((B, Ep), jnp.bfloat16)
                        for _ in range(n)),
        grid_spec=pltpu.PrefetchScalarGridSpec(
            num_scalar_prefetch=0,
            grid=(pl.cdiv(B, tile_b),),
            in_specs=[x_spec] * n + [
                _resident_spec((Dp, H1)),    # W1 (bf16, resident)
                _resident_spec((1, H1)),     # b1 (f32)
                _resident_spec((H1, Ep)),    # W2 (bf16, E padded to 128 lanes)
                _resident_spec((1, Ep)),     # b2 (f32, padded)
            ],
            out_specs=tuple(o_spec for _ in range(n)),
        ),
        compiler_params=pltpu.CompilerParams(
            dimension_semantics=("parallel",),
            vmem_limit_bytes=_vmem_limit(tile_b, Dp, H1, Ep, n)),
    )(*xs, w1, b1, w2p, b2p)


def _flatten_to(x, Dp):
    """torch .view(B, -1); only pads the feature dim when D is not 128-aligned."""
    B = x.shape[0]
    xf = x.reshape(B, -1)                   # free for contiguous inputs
    D = xf.shape[1]
    if Dp > D:
        xf = jnp.pad(xf, ((0, 0), (0, Dp - D)))
    return xf


# ----------------------------------------------------------------------------
# Module-level forwards
# ----------------------------------------------------------------------------
def siamese_forward(x1, x2, params, embed_dim, *, max_tile_b=256):
    """SiameseNet.forward: shared embedding net on both inputs, one fused call."""
    B = x1.shape[0]
    Dp = params[0].shape[0]
    x1f = _flatten_to(x1, Dp)
    x2f = _flatten_to(x2, Dp)
    tile_b = _choose_tile(B, max_tile=max_tile_b)
    o1, o2 = _mlp_call((x1f, x2f), params, tile_b)
    # bf16, lane-padded outputs; slice to E only where consumed.
    return o1[:, :embed_dim], o2[:, :embed_dim]


def get_embedding(x, params, embed_dim, *, max_tile_b=256):
    """SiameseNet.get_embedding: single-branch embedding (same kernel body)."""
    B = x.shape[0]
    Dp = params[0].shape[0]
    xf = _flatten_to(x, Dp)
    tile_b = _choose_tile(B, max_tile=max_tile_b)
    (o,) = _mlp_call((xf,), params, tile_b)
    return o[:, :embed_dim]


# ----------------------------------------------------------------------------
# Parameters
# ----------------------------------------------------------------------------
def init_params(key, in_dim, hidden, embed_dim):
    """f32 init mimicking nn.Linear default U(-1/sqrt(fan_in), +1/sqrt(fan_in))."""
    k1, k2, k3, k4 = jax.random.split(key, 4)
    s1 = 1.0 / jnp.sqrt(in_dim)
    s2 = 1.0 / jnp.sqrt(hidden)
    w1 = jax.random.uniform(k1, (in_dim, hidden), jnp.float32, -s1, s1)
    b1 = jax.random.uniform(k2, (1, hidden), jnp.float32, -s1, s1)
    w2 = jax.random.uniform(k3, (hidden, embed_dim), jnp.float32, -s2, s2)
    b2 = jax.random.uniform(k4, (1, embed_dim), jnp.float32, -s2, s2)
    return (w1, b1, w2, b2)


def prepare_params(params_f32, lane=_LANE):
    """One-time prep: bf16 weights (MXU), f32 biases; pad D and E to 128 so the
    contraction feed and the output stores are lane-dense."""
    w1, b1, w2, b2 = params_f32
    D, _ = w1.shape
    E = w2.shape[1]
    Dp = _round_up(D, lane)
    Ep = _round_up(E, lane)
    w1p = jnp.pad(w1, ((0, Dp - D), (0, 0))).astype(jnp.bfloat16)
    w2p = jnp.pad(w2, ((0, 0), (0, Ep - E))).astype(jnp.bfloat16)
    b2p = jnp.pad(b2, ((0, 0), (0, Ep - E)))
    return (w1p, b1, w2p, b2p)


# ----------------------------------------------------------------------------
# Reference (mirrors the kernel numerics: bf16 MXU inputs, f32 accumulation).
# Kernel output is additionally rounded to bf16 on store, hence bf16-level
# tolerances in the checks below.
# ----------------------------------------------------------------------------
def _reference_embed(x, params_f32):
    w1, b1, w2, b2 = params_f32
    xf = x.reshape(x.shape[0], -1)
    h = jnp.dot(xf.astype(jnp.bfloat16), w1.astype(jnp.bfloat16),
                preferred_element_type=jnp.float32) + b1
    h = jnp.maximum(h, 0.0)
    o = jnp.dot(h.astype(jnp.bfloat16), w2.astype(jnp.bfloat16),
                preferred_element_type=jnp.float32) + b2
    return o


if __name__ == "__main__":
    # Small shapes consistent with an image Siamese net: NCHW [2, 4, 16, 16].
    B, C, H, W = 2, 4, 16, 16
    D = C * H * W            # 1024
    HID = 256
    EMB = 32

    key = jax.random.PRNGKey(0)
    kx1, kx2, kp = jax.random.split(key, 3)
    x1 = jax.random.normal(kx1, (B, C, H, W), jnp.float32)
    x2 = jax.random.normal(kx2, (B, C, H, W), jnp.float32)

    params_f32 = init_params(kp, D, HID, EMB)
    params = prepare_params(params_f32)

    fwd = jax.jit(functools.partial(siamese_forward, params=params, embed_dim=EMB))
    out1, out2 = fwd(x1, x2)
    jax.block_until_ready((out1, out2))

    # Sanity check against a plain-JAX reference with matching numerics
    # (bf16 output store => bf16-level tolerance).
    ref1 = _reference_embed(x1, params_f32)
    ref2 = _reference_embed(x2, params_f32)
    assert out1.shape == (B, EMB) and out2.shape == (B, EMB)
    assert jnp.allclose(out1.astype(jnp.float32), ref1, atol=2e-2, rtol=2e-2)
    assert jnp.allclose(out2.astype(jnp.float32), ref2, atol=2e-2, rtol=2e-2)

    # get_embedding path (module's second method) reuses the same kernel body.
    emb1 = jax.jit(functools.partial(get_embedding, params=params, embed_dim=EMB))(x1)
    jax.block_until_ready(emb1)
    assert emb1.shape == (B, EMB)
    assert jnp.allclose(emb1.astype(jnp.float32), ref1, atol=2e-2, rtol=2e-2)

    print("KERNEL_OK")
</pallas_src>

<mosaic_0001>
module attributes {stable_mosaic.version = 11 : i64} {
  func.func @_siamese_kernel(%arg0: i32, %arg1: memref<2x1024xf32, #tpu.memory_space<vmem>>, %arg2: memref<2x1024xf32, #tpu.memory_space<vmem>>, %arg3: memref<1024x256xbf16, #tpu.memory_space<vmem>>, %arg4: memref<1x256xf32, #tpu.memory_space<vmem>>, %arg5: memref<256x128xbf16, #tpu.memory_space<vmem>>, %arg6: memref<1x128xf32, #tpu.memory_space<vmem>>, %arg7: memref<2x128xbf16, #tpu.memory_space<vmem>>, %arg8: memref<2x128xbf16, #tpu.memory_space<vmem>>) attributes {dimension_semantics = [#tpu.dimension_semantics<parallel>], iteration_bounds = array<i64: 1>, scalar_prefetch = 0 : i64, scratch_operands = 0 : i64, tpu.core_type = #tpu.core_type<tc>, window_params = [{transform_indices = @transform_0, window_bounds = array<i64: 2, 1024>}, {transform_indices = @transform_1, window_bounds = array<i64: 2, 1024>}, {pipeline_mode = #tpu.pipeline_mode<synchronous>, transform_indices = @transform_2, window_bounds = array<i64: 1024, 256>}, {pipeline_mode = #tpu.pipeline_mode<synchronous>, transform_indices = @transform_3, window_bounds = array<i64: 1, 256>}, {pipeline_mode = #tpu.pipeline_mode<synchronous>, transform_indices = @transform_4, window_bounds = array<i64: 256, 128>}, {pipeline_mode = #tpu.pipeline_mode<synchronous>, transform_indices = @transform_5, window_bounds = array<i64: 1, 128>}, {transform_indices = @transform_6, window_bounds = array<i64: 2, 128>}, {transform_indices = @transform_7, window_bounds = array<i64: 2, 128>}]} {
    %c0 = arith.constant 0 : index
    %c0_0 = arith.constant 0 : index
    %0 = vector.load %arg3[%c0, %c0_0] : memref<1024x256xbf16, #tpu.memory_space<vmem>>, vector<1024x256xbf16>
    %c0_1 = arith.constant 0 : index
    %c0_2 = arith.constant 0 : index
    %1 = vector.load %arg4[%c0_1, %c0_2] : memref<1x256xf32, #tpu.memory_space<vmem>>, vector<1x256xf32>
    %c0_3 = arith.constant 0 : index
    %c0_4 = arith.constant 0 : index
    %2 = vector.load %arg5[%c0_3, %c0_4] : memref<256x128xbf16, #tpu.memory_space<vmem>>, vector<256x128xbf16>
    %c0_5 = arith.constant 0 : index
    %c0_6 = arith.constant 0 : index
    %3 = vector.load %arg6[%c0_5, %c0_6] : memref<1x128xf32, #tpu.memory_space<vmem>>, vector<1x128xf32>
    %c0_7 = arith.constant 0 : index
    %c0_8 = arith.constant 0 : index
    %4 = vector.load %arg1[%c0_7, %c0_8] : memref<2x1024xf32, #tpu.memory_space<vmem>>, vector<2x1024xf32>
    %5 = arith.truncf %4 : vector<2x1024xf32> to vector<2x1024xbf16>
    %cst = arith.constant dense<0.000000e+00> : vector<2x256xf32>
    %6 = tpu.matmul %5, %0, %cst {dimension_numbers = #tpu.dot_dimension_numbers<[1], [0], [0], [1], [0, 0, 1, 1], [], []>} : vector<2x1024xbf16>, vector<1024x256xbf16>, vector<2x256xf32> -> vector<2x256xf32>
    %7 = vector.broadcast %1 : vector<1x256xf32> to vector<2x256xf32>
    %8 = arith.addf %6, %7 : vector<2x256xf32>
    %cst_9 = arith.constant 0.000000e+00 : f32
    %9 = vector.broadcast %cst_9 : f32 to vector<2x256xf32>
    %10 = arith.maximumf %8, %9 : vector<2x256xf32>
    %11 = arith.truncf %10 : vector<2x256xf32> to vector<2x256xbf16>
    %cst_10 = arith.constant dense<0.000000e+00> : vector<2x128xf32>
    %12 = tpu.matmul %11, %2, %cst_10 {dimension_numbers = #tpu.dot_dimension_numbers<[1], [0], [0], [1], [0, 0, 1, 1], [], []>} : vector<2x256xbf16>, vector<256x128xbf16>, vector<2x128xf32> -> vector<2x128xf32>
    %13 = vector.broadcast %3 : vector<1x128xf32> to vector<2x128xf32>
    %14 = arith.addf %12, %13 : vector<2x128xf32>
    %15 = arith.truncf %14 : vector<2x128xf32> to vector<2x128xbf16>
    %c0_11 = arith.constant 0 : index
    %c0_12 = arith.constant 0 : index
    %16 = vector.load %arg7[%c0_11, %c0_12] : memref<2x128xbf16, #tpu.memory_space<vmem>>, vector<2x128xbf16>
    tpu.vector_store %arg7[%c0_11, %c0_12], %15 {strides = array<i32>} : memref<2x128xbf16, #tpu.memory_space<vmem>>, vector<2x128xbf16>,
    %c0_13 = arith.constant 0 : index
    %c0_14 = arith.constant 0 : index
    %17 = vector.load %arg2[%c0_13, %c0_14] : memref<2x1024xf32, #tpu.memory_space<vmem>>, vector<2x1024xf32>
    %18 = arith.truncf %17 : vector<2x1024xf32> to vector<2x1024xbf16>
    %cst_15 = arith.constant dense<0.000000e+00> : vector<2x256xf32>
    %19 = tpu.matmul %18, %0, %cst_15 {dimension_numbers = #tpu.dot_dimension_numbers<[1], [0], [0], [1], [0, 0, 1, 1], [], []>} : vector<2x1024xbf16>, vector<1024x256xbf16>, vector<2x256xf32> -> vector<2x256xf32>
    %20 = vector.broadcast %1 : vector<1x256xf32> to vector<2x256xf32>
    %21 = arith.addf %19, %20 : vector<2x256xf32>
    %cst_16 = arith.constant 0.000000e+00 : f32
    %22 = vector.broadcast %cst_16 : f32 to vector<2x256xf32>
    %23 = arith.maximumf %21, %22 : vector<2x256xf32>
    %24 = arith.truncf %23 : vector<2x256xf32> to vector<2x256xbf16>
    %cst_17 = arith.constant dense<0.000000e+00> : vector<2x128xf32>
    %25 = tpu.matmul %24, %2, %cst_17 {dimension_numbers = #tpu.dot_dimension_numbers<[1], [0], [0], [1], [0, 0, 1, 1], [], []>} : vector<2x256xbf16>, vector<256x128xbf16>, vector<2x128xf32> -> vector<2x128xf32>
    %26 = vector.broadcast %3 : vector<1x128xf32> to vector<2x128xf32>
    %27 = arith.addf %25, %26 : vector<2x128xf32>
    %28 = arith.truncf %27 : vector<2x128xf32> to vector<2x128xbf16>
    %c0_18 = arith.constant 0 : index
    %c0_19 = arith.constant 0 : index
    %29 = vector.load %arg8[%c0_18, %c0_19] : memref<2x128xbf16, #tpu.memory_space<vmem>>, vector<2x128xbf16>
    tpu.vector_store %arg8[%c0_18, %c0_19], %28 {strides = array<i32>} : memref<2x128xbf16, #tpu.memory_space<vmem>>, vector<2x128xbf16>,
    return
  }
  func.func @transform_0(%arg0: i32) -> (i32, i32) {
    %c0_i32 = arith.constant 0 : i32
    %c0_i32_0 = arith.constant 0 : i32
    return %arg0, %c0_i32 : i32, i32
  }
  func.func @transform_1(%arg0: i32) -> (i32, i32) {
    %c0_i32 = arith.constant 0 : i32
    %c0_i32_0 = arith.constant 0 : i32
    return %arg0, %c0_i32 : i32, i32
  }
  func.func @transform_2(%arg0: i32) -> (i32, i32) {
    %c0_i32 = arith.constant 0 : i32
    %c0_i32_0 = arith.constant 0 : i32
    %c0_i32_1 = arith.constant 0 : i32
    return %c0_i32, %c0_i32_0 : i32, i32
  }
  func.func @transform_3(%arg0: i32) -> (i32, i32) {
    %c0_i32 = arith.constant 0 : i32
    %c0_i32_0 = arith.constant 0 : i32
    %c0_i32_1 = arith.constant 0 : i32
    return %c0_i32, %c0_i32_0 : i32, i32
  }
  func.func @transform_4(%arg0: i32) -> (i32, i32) {
    %c0_i32 = arith.constant 0 : i32
    %c0_i32_0 = arith.constant 0 : i32
    %c0_i32_1 = arith.constant 0 : i32
    return %c0_i32, %c0_i32_0 : i32, i32
  }
  func.func @transform_5(%arg0: i32) -> (i32, i32) {
    %c0_i32 = arith.constant 0 : i32
    %c0_i32_0 = arith.constant 0 : i32
    %c0_i32_1 = arith.constant 0 : i32
    return %c0_i32, %c0_i32_0 : i32, i32
  }
  func.func @transform_6(%arg0: i32) -> (i32, i32) {
    %c0_i32 = arith.constant 0 : i32
    %c0_i32_0 = arith.constant 0 : i32
    return %arg0, %c0_i32 : i32, i32
  }
  func.func @transform_7(%arg0: i32) -> (i32, i32) {
    %c0_i32 = arith.constant 0 : i32
    %c0_i32_0 = arith.constant 0 : i32
    return %arg0, %c0_i32 : i32, i32
  }
}

</mosaic_0001>

<bundles_post_ra>
// kernel: siamese_forward.1
= control target key start
LH: loop header
LB: loop body
LE: loop exit
PB: predicated region body
PF: predicated region fallthrough
CT: control target
= control target key end

     0   :  { %13 = vsyncpa [#allocation3], 0  ;;  %s3084_s0 = inlined_call_operand.vmem [shape: f32[2,1024], index: 0, kind: input, shape index: {}]   ;;  %s3085_s1 = inlined_call_operand.vmem [shape: f32[2,1024], index: 1, kind: input, shape index: {}]   ;;  %s3086_s2 = inlined_call_operand.hbm [shape: bf16[1024,256], index: 2, kind: input, shape index: {}]   ;;  %s3087_s3 = inlined_call_operand.vmem [shape: f32[1,256], index: 3, kind: input, shape index: {}]   ;;  %s3088_s4 = inlined_call_operand.vmem [shape: bf16[256,128], index: 4, kind: input, shape index: {}]   ;;  %s3089_s5 = inlined_call_operand.vmem [shape: f32[1,128], index: 5, kind: input, shape index: {}]   ;;  %s3090_s6 = inlined_call_operand.hbm [shape: bf16[2,128], index: 6, kind: output, shape index: {0}]   ;;  %s3091_s7 = inlined_call_operand.hbm [shape: bf16[2,128], index: 7, kind: output, shape index: {1}]  }
   0x1   :  { %14 = vsyncpa [#allocation4], 0 }
   0x2   :  { %15 = vsyncpa [#allocation7], 0  ;;  %s24_s26 = sshll.u32 %s3086_s2, 4  ;;  %s2328_s27 = smov [#allocation2]   ;;  %s25_s26 = int_to_ptr.hbm [resolvable:$true] %s24_s26 }
   0x3   :  { %s26_s28 = sshll.u32 %s2328_s27, 4  ;;  %s2329_s29 = smov 128   ;;  %s27_s28 = int_to_ptr.vmem [resolvable:$true] %s26_s28 }
   0x4   :  { %s2330_s30 = smov 8  }
   0x5   :  { %32 = dma.hbm_to_vmem [thread:$0]  %s25_s26, 16384, %s27_s28, [#allocation3], %s2329_s29, %s2329_s29, %s2330_s30  }
   0x6   :  { %2322 = dma.done.wait [#allocation3], 16384  }
   0x7   :  { %2323 = vsyncadd [#allocation3], 4294950912  ;;  %v1582_v0 = vld [vmem:[#allocation2 + $0x70] sm:$0xf]  ;;  %v2115_v1 = vld [vmem:[#allocation2 + $0x74] sm:$0xf0] }
   0x8   :  { %v1646_v2 = vld [vmem:[#allocation2 + $0xf0] sm:$0xf]  ;;  %v2376_v3 = vor.u32 %v2115_v1, %v1582_v0  ;;  %v2131_v4 = vld [vmem:[#allocation2 + $0xf4] sm:$0xf0]  ;;  %v1574_v11 = vld [vmem:[#allocation2 + $0x60] sm:$0xf] }
   0x9   :  { %v1710_v5 = vld [vmem:[#allocation2 + $0x170] sm:$0xf]  ;;  %v2147_v6 = vld [vmem:[#allocation2 + $0x174] sm:$0xf0]  ;;  %v2378_v7 = vor.u32 %v2131_v4, %v1646_v2  ;;  %v2113_v13 = vld [vmem:[#allocation2 + $0x64] sm:$0xf0] }
   0xa   :  { %v2380_v8 = vor.u32 %v2147_v6, %v1710_v5  ;;  %v1774_v9 = vld [vmem:[#allocation2 + $0x1f0] sm:$0xf]  ;;  %v2163_v10 = vld [vmem:[#allocation2 + $0x1f4] sm:$0xf0]  ;;  %881 = vmatpush.bf16.msra.mxu0 %v2376_v3  ;;  %v1638_v14 = vld [vmem:[#allocation2 + $0xe0] sm:$0xf]  ;;  %v2387_v16 = vor.u32 %v2113_v13, %v1574_v11 }
   0xb   :  { %v2383_v12 = vor.u32 %v2163_v10, %v1774_v9  ;;  %v2129_v15 = vld [vmem:[#allocation2 + $0xe4] sm:$0xf0]  ;;  %894 = vmatpush.bf16.msra.mxu1 %v2378_v7  ;;  %v1702_v18 = vld [vmem:[#allocation2 + $0x160] sm:$0xf]  ;;  %v1566_v23 = vld [vmem:[#allocation2 + $0x50] sm:$0xf] }
   0xc   :  { %907 = vmatpush.bf16.msra.mxu2 %v2380_v8  ;;  %v2389_v17 = vor.u32 %v2129_v15, %v1638_v14  ;;  %v2145_v19 = vld [vmem:[#allocation2 + $0x164] sm:$0xf0]  ;;  %v1766_v20 = vld [vmem:[#allocation2 + $0x1e0] sm:$0xf]  ;;  %v2111_v24 = vld [vmem:[#allocation2 + $0x54] sm:$0xf0] }
   0xd   :  { %3171 = vst [vmem:[#allocation11_spill] sm:$0xff] %v2383_v12  ;;  %920 = vmatpush.bf16.msra.mxu3 %v2383_v12  ;;  %v2392_v21 = vor.u32 %v2145_v19, %v1702_v18  ;;  %v2161_v22 = vld [vmem:[#allocation2 + $0x1e4] sm:$0xf0]  ;;  %v1630_v26 = vld [vmem:[#allocation2 + $0xd0] sm:$0xf]  ;;  %v2397_v29 = vor.u32 %v2111_v24, %v1566_v23  ;;  %s1498_s24 = sshll.u32 %s3090_s6, 4  ;;  %s1499_s24 = int_to_ptr.hbm [resolvable:$true] %s1498_s24 }
   0xe   :  { %v2394_v25 = vor.u32 %v2161_v22, %v1766_v20  ;;  %v2127_v27 = vld [vmem:[#allocation2 + $0xd4] sm:$0xf0]  ;;  %v1694_v28 = vld [vmem:[#allocation2 + $0x150] sm:$0xf]  ;;  %882 = vmatpush.bf16.msra.mxu0 %v2387_v16  ;;  %v1558_v35 = vld [vmem:[#allocation2 + $0x40] sm:$0xf] }
   0xf   :  { %3172 = vst [vmem:[#allocation12_spill] sm:$0xff] %v2392_v21  ;;  %v2143_v30 = vld [vmem:[#allocation2 + $0x154] sm:$0xf0]  ;;  %v1758_v31 = vld [vmem:[#allocation2 + $0x1d0] sm:$0xf]  ;;  %895 = vmatpush.bf16.msra.mxu1 %v2389_v17  ;;  %v2401_v33 = vor.u32 %v2127_v27, %v1630_v26  ;;  %s2332_s25 = smov [#allocation6]  }
  0x10   :  { %3173 = vst [vmem:[#allocation13_spill] sm:$0xff] %v2394_v25  ;;  %v2159_v32 = vld [vmem:[#allocation2 + $0x1d4] sm:$0xf0]  ;;  %908 = vmatpush.bf16.msra.mxu2 %v2392_v21  ;;  %v2403_v34 = vor.u32 %v2143_v30, %v1694_v28  ;;  %v2109_v36 = vld [vmem:[#allocation2 + $0x44] sm:$0xf0]  ;;  %s1507_s26 = sshll.u32 %s2332_s25, 4  ;;  %s1508_s26 = int_to_ptr.vmem [resolvable:$true] %s1507_s26 }
  0x11   :  { %v1622_v37 = vld [vmem:[#allocation2 + $0xc0] sm:$0xf]  ;;  %921 = vmatpush.bf16.msra.mxu3 %v2394_v25  ;;  %v2406_v38 = vor.u32 %v2159_v32, %v1758_v31  ;;  %v2125_v39 = vld [vmem:[#allocation2 + $0xc4] sm:$0xf0]  ;;  %v2409_v44 = vor.u32 %v2109_v36, %v1558_v35  ;;  %v1550_v47 = vld [vmem:[#allocation2 + $0x30] sm:$0xf] }
  0x12   :  { %3174 = vst [vmem:[#allocation14_spill] sm:$0xff] %v2403_v34  ;;  %v1686_v40 = vld [vmem:[#allocation2 + $0x140] sm:$0xf]  ;;  %v2141_v41 = vld [vmem:[#allocation2 + $0x144] sm:$0xf0]  ;;  %883 = vmatpush.bf16.msra.mxu0 %v2397_v29  ;;  %v2413_v45 = vor.u32 %v2125_v39, %v1622_v37  ;;  %s1509_s29 = sshll.u32 %s3091_s7, 4  ;;  %s1510_s29 = int_to_ptr.hbm [resolvable:$true] %s1509_s29 }
  0x13   :  { %3175 = vst [vmem:[#allocation15_spill] sm:$0xff] %v2406_v38  ;;  %v1750_v42 = vld [vmem:[#allocation2 + $0x1c0] sm:$0xf]  ;;  %v2157_v43 = vld [vmem:[#allocation2 + $0x1c4] sm:$0xf0]  ;;  %896 = vmatpush.bf16.msra.mxu1 %v2401_v33  ;;  %v2415_v46 = vor.u32 %v2141_v41, %v1686_v40 }
  0x14   :  { %909 = vmatpush.bf16.msra.mxu2 %v2403_v34  ;;  %v2107_v48 = vld [vmem:[#allocation2 + $0x34] sm:$0xf0]  ;;  %v1614_v49 = vld [vmem:[#allocation2 + $0xb0] sm:$0xf]  ;;  %v2418_v50 = vor.u32 %v2157_v43, %v1750_v42  ;;  %v1542_v59 = vld [vmem:[#allocation2 + $0x20] sm:$0xf] }
  0x15   :  { %3176 = vst [vmem:[#allocation16_spill] sm:$0xff] %v2415_v46  ;;  %922 = vmatpush.bf16.msra.mxu3 %v2406_v38  ;;  %v2123_v51 = vld [vmem:[#allocation2 + $0xb4] sm:$0xf0]  ;;  %v1678_v52 = vld [vmem:[#allocation2 + $0x130] sm:$0xf]  ;;  %v2421_v56 = vor.u32 %v2107_v48, %v1550_v47 }
  0x16   :  { %3177 = vst [vmem:[#allocation17_spill] sm:$0xff] %v2418_v50  ;;  %v2139_v53 = vld [vmem:[#allocation2 + $0x134] sm:$0xf0]  ;;  %v1742_v54 = vld [vmem:[#allocation2 + $0x1b0] sm:$0xf]  ;;  %884 = vmatpush.bf16.msra.mxu0 %v2409_v44  ;;  %v2425_v57 = vor.u32 %v2123_v51, %v1614_v49 }
  0x17   :  { %v2155_v55 = vld [vmem:[#allocation2 + $0x1b4] sm:$0xf0]  ;;  %897 = vmatpush.bf16.msra.mxu1 %v2413_v45  ;;  %v2427_v58 = vor.u32 %v2139_v53, %v1678_v52  ;;  %v2105_v60 = vld [vmem:[#allocation2 + $0x24] sm:$0xf0]  ;;  %v1606_v61 = vld [vmem:[#allocation2 + $0xa0] sm:$0xf] }
  0x18   :  { %910 = vmatpush.bf16.msra.mxu2 %v2415_v46  ;;  %v2430_v62 = vor.u32 %v2155_v55, %v1742_v54  ;;  %v2121_v63 = vld [vmem:[#allocation2 + $0xa4] sm:$0xf0]  ;;  %v1670_v0 = vld [vmem:[#allocation2 + $0x120] sm:$0xf]  ;;  %v2433_v5 = vor.u32 %v2105_v60, %v1542_v59  ;;  %v1534_v10 = vld [vmem:[#allocation2 + $0x10] sm:$0xf] }
  0x19   :  { %3178 = vst [vmem:[#allocation18_spill] sm:$0xff] %v2427_v58  ;;  %923 = vmatpush.bf16.msra.mxu3 %v2418_v50  ;;  %v2137_v1 = vld [vmem:[#allocation2 + $0x124] sm:$0xf0]  ;;  %v1734_v2 = vld [vmem:[#allocation2 + $0x1a0] sm:$0xf]  ;;  %v2437_v6 = vor.u32 %v2121_v63, %v1606_v61 }
  0x1a   :  { %3179 = vst [vmem:[#allocation19_spill] sm:$0xff] %v2430_v62  ;;  %v2153_v4 = vld [vmem:[#allocation2 + $0x1a4] sm:$0xf0]  ;;  %885 = vmatpush.bf16.msra.mxu0 %v2421_v56  ;;  %v2439_v9 = vor.u32 %v2137_v1, %v1670_v0  ;;  %v2103_v11 = vld [vmem:[#allocation2 + $0x14] sm:$0xf0] }
  0x1b   :  { %898 = vmatpush.bf16.msra.mxu1 %v2425_v57  ;;  %v1598_v13 = vld [vmem:[#allocation2 + $0x90] sm:$0xf]  ;;  %v2442_v14 = vor.u32 %v2153_v4, %v1734_v2  ;;  %v2119_v15 = vld [vmem:[#allocation2 + $0x94] sm:$0xf0]  ;;  %v2445_v23 = vor.u32 %v2103_v11, %v1534_v10  ;;  %v1526_v24 = vld [vmem:[#allocation2] sm:$0xf] }
  0x1c   :  { %911 = vmatpush.bf16.msra.mxu2 %v2427_v58  ;;  %3180 = vst [vmem:[#allocation20_spill] sm:$0xff] %v2439_v9  ;;  %v1662_v18 = vld [vmem:[#allocation2 + $0x110] sm:$0xf]  ;;  %v2135_v19 = vld [vmem:[#allocation2 + $0x114] sm:$0xf0]  ;;  %v2449_v27 = vor.u32 %v2119_v15, %v1598_v13 }
  0x1d   :  { %924 = vmatpush.bf16.msra.mxu3 %v2430_v62  ;;  %3181 = vst [vmem:[#allocation21_spill] sm:$0xff] %v2442_v14  ;;  %v1726_v20 = vld [vmem:[#allocation2 + $0x190] sm:$0xf]  ;;  %v2151_v22 = vld [vmem:[#allocation2 + $0x194] sm:$0xf0]  ;;  %v2451_v28 = vor.u32 %v2135_v19, %v1662_v18  ;;  %v206_v62 = vld [vmem:[%s3084_s0 + $0x8] sm:$0xff] }
  0x1e   :  { %886 = vmatpush.bf16.msra.mxu0 %v2433_v5  ;;  %v2101_v26 = vld [vmem:[#allocation2 + $0x4] sm:$0xf0]  ;;  %v1590_v30 = vld [vmem:[#allocation2 + $0x80] sm:$0xf]  ;;  %v2454_v35 = vor.u32 %v2151_v22, %v1726_v20  ;;  %v1838_v40 = vld [vmem:[#allocation2 + $0x270] sm:$0xf] }
  0x1f   :  { %899 = vmatpush.bf16.msra.mxu1 %v2437_v6  ;;  %3182 = vst [vmem:[#allocation22_spill] sm:$0xff] %v2451_v28  ;;  %v2117_v31 = vld [vmem:[#allocation2 + $0x84] sm:$0xf0]  ;;  %v1654_v32 = vld [vmem:[#allocation2 + $0x100] sm:$0xf]  ;;  %v2457_v43 = vor.u32 %v2101_v26, %v1526_v24  ;;  %v205_v18 = vld [vmem:[%s3084_s0] sm:$0xff] }
  0x20   :  { %912 = vmatpush.bf16.msra.mxu2 %v2439_v9  ;;  %3183 = vst [vmem:[#allocation23_spill] sm:$0xff] %v2454_v35  ;;  %v2133_v36 = vld [vmem:[#allocation2 + $0x104] sm:$0xf0]  ;;  %v1718_v37 = vld [vmem:[#allocation2 + $0x180] sm:$0xf]  ;;  %v2461_v51 = vor.u32 %v2117_v31, %v1590_v30 }
  0x21   :  { %925 = vmatpush.bf16.msra.mxu3 %v2442_v14  ;;  %v2149_v39 = vld [vmem:[#allocation2 + $0x184] sm:$0xf0]  ;;  %v2179_v41 = vld [vmem:[#allocation2 + $0x274] sm:$0xf0]  ;;  %v1902_v42 = vld [vmem:[#allocation2 + $0x2f0] sm:$0xf]  ;;  %v2463_v52 = vor.u32 %v2133_v36, %v1654_v32 }
  0x22   :  { %887 = vmatpush.bf16.msra.mxu0 %v2445_v23  ;;  %v2195_v47 = vld [vmem:[#allocation2 + $0x2f4] sm:$0xf0]  ;;  %v1966_v48 = vld [vmem:[#allocation2 + $0x370] sm:$0xf]  ;;  %v2466_v55 = vor.u32 %v2149_v39, %v1718_v37  ;;  %v2468_v59 = vor.u32 %v2179_v41, %v1838_v40  ;;  %v1830_v63 = vld [vmem:[#allocation2 + $0x260] sm:$0xf] }
  0x23   :  { %v2211_v49 = vld [vmem:[#allocation2 + $0x374] sm:$0xf0]  ;;  %900 = vmatpush.bf16.msra.mxu1 %v2449_v27  ;;  %3184 = vst [vmem:[#allocation24_spill] sm:$0xff] %v2463_v52  ;;  %v2030_v53 = vld [vmem:[#allocation2 + $0x3f0] sm:$0xf]  ;;  %v2470_v60 = vor.u32 %v2195_v47, %v1902_v42 }
  0x24   :  { %913 = vmatpush.bf16.msra.mxu2 %v2451_v28  ;;  %v2227_v54 = vld [vmem:[#allocation2 + $0x3f4] sm:$0xf0]  ;;  %3185 = vst [vmem:[#allocation25_spill] sm:$0xff] %v2466_v55  ;;  %v2472_v61 = vor.u32 %v2211_v49, %v1966_v48  ;;  %v2177_v0 = vld [vmem:[#allocation2 + $0x264] sm:$0xf0] }
  0x25   :  { %926 = vmatpush.bf16.msra.mxu3 %v2454_v35  ;;  %v1894_v1 = vld [vmem:[#allocation2 + $0x2e0] sm:$0xf]  ;;  %v2475_v2 = vor.u32 %v2227_v54, %v2030_v53  ;;  %v2193_v4 = vld [vmem:[#allocation2 + $0x2e4] sm:$0xf0]  ;;  %v2484_v19 = vor.u32 %v2177_v0, %v1830_v63  ;;  %209 = vst [vmem:[#allocation1] ss:$4 sm:$0xff] %v205_v18 }
  0x26   :  { %3186 = vst [vmem:[#allocation26_spill] sm:$0xff] %v2472_v61  ;;  %888 = vmatpush.bf16.msra.mxu0 %v2457_v43  ;;  %v1958_v10 = vld [vmem:[#allocation2 + $0x360] sm:$0xf]  ;;  %v2209_v11 = vld [vmem:[#allocation2 + $0x364] sm:$0xf0]  ;;  %v2488_v20 = vor.u32 %v2193_v4, %v1894_v1 }
  0x27   :  { %3187 = vst [vmem:[#allocation27_spill] sm:$0xff] %v2475_v2  ;;  %901 = vmatpush.bf16.msra.mxu1 %v2461_v51  ;;  %v2022_v13 = vld [vmem:[#allocation2 + $0x3e0] sm:$0xf]  ;;  %v2225_v15 = vld [vmem:[#allocation2 + $0x3e4] sm:$0xf0]  ;;  %v2490_v22 = vor.u32 %v2209_v11, %v1958_v10  ;;  %v1220_v11 = vld [vmem:[%s3085_s1] sm:$0xff] }
  0x28   :  { %914 = vmatpush.bf16.msra.mxu2 %v2463_v52  ;;  %v1822_v24 = vld [vmem:[#allocation2 + $0x250] sm:$0xf]  ;;  %v2175_v26 = vld [vmem:[#allocation2 + $0x254] sm:$0xf0]  ;;  %v2493_v31 = vor.u32 %v2225_v15, %v2022_v13  ;;  %v1814_v42 = vld [vmem:[#allocation2 + $0x240] sm:$0xf] }
  0x29   :  { %927 = vmatpush.bf16.msra.mxu3 %v2466_v55  ;;  %3188 = vst [vmem:[#allocation28_spill] sm:$0xff] %v2490_v22  ;;  %v1886_v30 = vld [vmem:[#allocation2 + $0x2d0] sm:$0xf]  ;;  %v2191_v32 = vld [vmem:[#allocation2 + $0x2d4] sm:$0xf0]  ;;  %v2496_v41 = vor.u32 %v2175_v26, %v1822_v24 }
  0x2a   :  { %933 = vmatpush.bf16.msrb.mxu0 %v2468_v59  ;;  %3189 = vst [vmem:[#allocation29_spill] sm:$0xff] %v2493_v31  ;;  %v1950_v36 = vld [vmem:[#allocation2 + $0x350] sm:$0xf]  ;;  %v2207_v37 = vld [vmem:[#allocation2 + $0x354] sm:$0xf0]  ;;  %v2500_v49 = vor.u32 %v2191_v32, %v1886_v30 }
  0x2b   :  { %946 = vmatpush.bf16.msrb.mxu1 %v2470_v60  ;;  %v2014_v39 = vld [vmem:[#allocation2 + $0x3d0] sm:$0xf]  ;;  %v2223_v40 = vld [vmem:[#allocation2 + $0x3d4] sm:$0xf0]  ;;  %v2173_v47 = vld [vmem:[#allocation2 + $0x244] sm:$0xf0]  ;;  %v2502_v53 = vor.u32 %v2207_v37, %v1950_v36 }
  0x2c   :  { %959 = vmatpush.bf16.msrb.mxu2 %v2472_v61  ;;  %v1878_v48 = vld [vmem:[#allocation2 + $0x2c0] sm:$0xf]  ;;  %v2189_v54 = vld [vmem:[#allocation2 + $0x2c4] sm:$0xf0]  ;;  %v2505_v1 = vor.u32 %v2223_v40, %v2014_v39  ;;  %v1806_v15 = vld [vmem:[#allocation2 + $0x230] sm:$0xf]  ;;  %v2511_v24 = vor.u32 %v2173_v47, %v1814_v42 }
  0x2d   :  { %972 = vmatpush.bf16.msrb.mxu3 %v2475_v2  ;;  %3190 = vst [vmem:[#allocation30_spill] sm:$0xff] %v2502_v53  ;;  %v1942_v63 = vld [vmem:[#allocation2 + $0x340] sm:$0xf]  ;;  %v2205_v0 = vld [vmem:[#allocation2 + $0x344] sm:$0xf0]  ;;  %v2513_v26 = vor.u32 %v2189_v54, %v1878_v48 }
  0x2e   :  { %934 = vmatpush.bf16.msrb.mxu0 %v2484_v19  ;;  %3191 = vst [vmem:[#allocation31_spill] sm:$0xff] %v2505_v1  ;;  %v2006_v4 = vld [vmem:[#allocation2 + $0x3c0] sm:$0xf]  ;;  %v2221_v10 = vld [vmem:[#allocation2 + $0x3c4] sm:$0xf0]  ;;  %v2521_v39 = vor.u32 %v2205_v0, %v1942_v63 }
  0x2f   :  { %947 = vmatpush.bf16.msrb.mxu1 %v2488_v20  ;;  %v214_v13 = vld.sshfl [vmem:[#allocation1 + $0x10] sm:$0xff pattern:$0x73625140]  ;;  %v212_v18 = vld.sshfl [vmem:[#allocation1] sm:$0xff pattern:$0x73625140]  ;;  %v2528_v47 = vor.u32 %v2221_v10, %v2006_v4 }
  0x30   :  { %960 = vmatpush.bf16.msrb.mxu2 %v2490_v22  ;;  %v2515_v30 = vpack.c.bf16 %v214_v13, %v214_v13  ;;  %v2517_v32 = vpack.c.bf16 %v212_v18, %v212_v18  ;;  %v215_v36 = vld.sshfl [vmem:[#allocation1 + $0x18] sm:$0xff pattern:$0x73625140]  ;;  %v213_v37 = vld.sshfl [vmem:[#allocation1 + $0x8] sm:$0xff pattern:$0x73625140] }
  0x31   :  { %973 = vmatpush.bf16.msrb.mxu3 %v2493_v31  ;;  %3192 = vst [vmem:[#allocation32_spill] sm:$0xff] %v2521_v39  ;;  %v2171_v40 = vld [vmem:[#allocation2 + $0x234] sm:$0xf0]  ;;  %v1870_v31 = vld [vmem:[#allocation2 + $0x2b0] sm:$0xf]  ;;  %v2523_v2 = vpack.c.bf16 %v215_v36, %v215_v36  ;;  %v2525_v42 = vpack.c.bf16 %v213_v37, %v213_v37 }
  0x32   :  { %935 = vmatpush.bf16.msrb.mxu0 %v2496_v41  ;;  %1224 = vst [vmem:[#allocation1] ss:$4 sm:$0xff] %v1220_v11  ;;  %915 = vmatmul.bf16.vlgmr.msra.gmra.mxu2 %v2515_v30  ;;  %v2187_v48 = vld [vmem:[#allocation2 + $0x2b4] sm:$0xf0]  ;;  %v1934_v54 = vld [vmem:[#allocation2 + $0x330] sm:$0xf]  ;;  %v2534_v63 = vor.u32 %v2171_v40, %v1806_v15 }
  0x33   :  { %948 = vmatpush.bf16.msrb.mxu1 %v2500_v49  ;;  %3193 = vst [vmem:[#allocation33_spill] sm:$0xff] %v2528_v47  ;;  %v2203_v13 = vld [vmem:[#allocation2 + $0x334] sm:$0xf0]  ;;  %v1998_v18 = vld [vmem:[#allocation2 + $0x3b0] sm:$0xf]  ;;  %889 = vmatmul.bf16.vlgmr.msra.gmra.mxu0 %v2517_v32  ;;  %v2539_v0 = vor.u32 %v2187_v48, %v1870_v31 }
  0x34   :  { %961 = vmatpush.bf16.msrb.mxu2 %v2502_v53  ;;  %v2219_v55 = vld [vmem:[#allocation2 + $0x3b4] sm:$0xf0]  ;;  %928 = vmatmul.bf16.vlgmr.msra.gmra.mxu3 %v2523_v2  ;;  %v2541_v4 = vor.u32 %v2203_v13, %v1934_v54  ;;  %v1798_v10 = vld [vmem:[#allocation2 + $0x220] sm:$0xf]  ;;  %v2169_v11 = vld [vmem:[#allocation2 + $0x224] sm:$0xf0] }
  0x35   :  { %974 = vmatpush.bf16.msrb.mxu3 %v2505_v1  ;;  %902 = vmatmul.bf16.vlgmr.msra.gmra.mxu1 %v2525_v42  ;;  %v1862_v36 = vld [vmem:[#allocation2 + $0x2a0] sm:$0xf]  ;;  %v2544_v37 = vor.u32 %v2219_v55, %v1998_v18  ;;  %v2185_v1 = vld [vmem:[#allocation2 + $0x2a4] sm:$0xf0]  ;;  %v2550_v31 = vor.u32 %v2169_v11, %v1798_v10  ;;  %v1790_v48 = vld [vmem:[#allocation2 + $0x210] sm:$0xf] }
  0x36   :  { %936 = vmatpush.bf16.msrb.mxu0 %v2511_v24  ;;  %3194 = vst [vmem:[#allocation34_spill] sm:$0xff] %v2541_v4  ;;  %v1926_v15 = vld [vmem:[#allocation2 + $0x320] sm:$0xf]  ;;  %v2201_v40 = vld [vmem:[#allocation2 + $0x324] sm:$0xf0]  ;;  %v2554_v55 = vor.u32 %v2185_v1, %v1862_v36 }
  0x37   :  { %949 = vmatpush.bf16.msrb.mxu1 %v2513_v26  ;;  %3195 = vst [vmem:[#allocation35_spill] sm:$0xff] %v2544_v37  ;;  %v1990_v35 = vld [vmem:[#allocation2 + $0x3a0] sm:$0xf]  ;;  %v2217_v14 = vld [vmem:[#allocation2 + $0x3a4] sm:$0xf0]  ;;  %v2556_v54 = vor.u32 %v2201_v40, %v1926_v15 }
  0x38   :  { %962 = vmatpush.bf16.msrb.mxu2 %v2521_v39  ;;  %211 = vst [vmem:[#allocation1 + $0x20] ss:$4 sm:$0xff] %v206_v62  ;;  %v2167_v13 = vld [vmem:[#allocation2 + $0x214] sm:$0xf0]  ;;  %v1854_v18 = vld [vmem:[#allocation2 + $0x290] sm:$0xf]  ;;  %v2559_v39 = vor.u32 %v2217_v14, %v1990_v35 }
  0x39   :  { %975 = vmatpush.bf16.msrb.mxu3 %v2528_v47  ;;  %3196 = vst [vmem:[#allocation36_spill] sm:$0xff] %v2556_v54  ;;  %v2183_v47 = vld [vmem:[#allocation2 + $0x294] sm:$0xf0]  ;;  %v1918_v50 = vld [vmem:[#allocation2 + $0x310] sm:$0xf] }
  0x3a   :  { %937 = vmatpush.bf16.msrb.mxu0 %v2534_v63  ;;  %3197 = vst [vmem:[#allocation37_spill] sm:$0xff] %v2559_v39  ;;  %v2199_v10 = vld [vmem:[#allocation2 + $0x314] sm:$0xf0]  ;;  %v1982_v11 = vld [vmem:[#allocation2 + $0x390] sm:$0xf]  ;;  %v2566_v14 = vor.u32 %v2183_v47, %v1854_v18 }
  0x3b   :  { %950 = vmatpush.bf16.msrb.mxu1 %v2539_v0  ;;  %v2215_v53 = vld [vmem:[#allocation2 + $0x394] sm:$0xf0]  ;;  %v1782_v62 = vld [vmem:[#allocation2 + $0x200] sm:$0xf]  ;;  %v2165_v38 = vld [vmem:[#allocation2 + $0x204] sm:$0xf0]  ;;  %v2568_v35 = vor.u32 %v2199_v10, %v1918_v50 }
  0x3c   :  { %963 = vmatpush.bf16.msrb.mxu2 %v2541_v4  ;;  %v2562_v4 = vor.u32 %v2167_v13, %v1790_v48  ;;  %v1846_v1 = vld [vmem:[#allocation2 + $0x280] sm:$0xf]  ;;  %v2181_v36 = vld [vmem:[#allocation2 + $0x284] sm:$0xf0]  ;;  %3198 = vst [vmem:[#allocation38_spill] sm:$0xff] %v2566_v14  ;;  %v2571_v48 = vor.u32 %v2215_v53, %v1982_v11  ;;  %v2577_v50 = vor.u32 %v2165_v38, %v1782_v62 }
  0x3d   :  { %976 = vmatpush.bf16.msrb.mxu3 %v2544_v37  ;;  %v1910_v15 = vld [vmem:[#allocation2 + $0x300] sm:$0xf]  ;;  %v2197_v40 = vld [vmem:[#allocation2 + $0x304] sm:$0xf0]  ;;  %3199 = vst [vmem:[#allocation39_spill] sm:$0xff] %v2568_v35  ;;  %v2581_v53 = vor.u32 %v2181_v36, %v1846_v1 }
  0x3e   :  { %938 = vmatpush.bf16.msrb.mxu0 %v2550_v31  ;;  %v1974_v37 = vld [vmem:[#allocation2 + $0x380] sm:$0xf]  ;;  %v2213_v22 = vld [vmem:[#allocation2 + $0x384] sm:$0xf0]  ;;  %v2114_v25 = vld [vmem:[#allocation2 + $0x74] sm:$0xf]  ;;  %v2583_v11 = vor.u32 %v2197_v40, %v1910_v15 }
  0x3f   :  { %951 = vmatpush.bf16.msrb.mxu1 %v2554_v55  ;;  %v1584_v61 = vld [vmem:[#allocation2 + $0x78] sm:$0xf0]  ;;  %3200 = vst [vmem:[#allocation40_spill] sm:$0xff] %v2571_v48  ;;  %v2130_v13 = vld [vmem:[#allocation2 + $0xf4] sm:$0xf]  ;;  %v2586_v46 = vor.u32 %v2213_v22, %v1974_v37 }
  0x40   :  { %964 = vmatpush.bf16.msrb.mxu2 %v2556_v54  ;;  %v1648_v12 = vld [vmem:[#allocation2 + $0xf8] sm:$0xf0]  ;;  %v2146_v52 = vld [vmem:[#allocation2 + $0x174] sm:$0xf]  ;;  %v1221_v54 = vld [vmem:[%s3085_s1 + $0x8] sm:$0xff]  ;;  %3201 = vst [vmem:[#allocation41_spill] sm:$0xff] %v2577_v50  ;;  %v2588_v34 = vor.u32 %v2114_v25, %v1584_v61 }
  0x41   :  { %977 = vmatpush.bf16.msrb.mxu3 %v2559_v39  ;;  %v1712_v28 = vld [vmem:[#allocation2 + $0x178] sm:$0xf0]  ;;  %v218_v47 = vld.sshfl [vmem:[#allocation1 + $0x30] sm:$0xff pattern:$0x73625140]  ;;  %3202 = vst [vmem:[#allocation42_spill] sm:$0xff] %v2581_v53  ;;  %v2590_v38 = vor.u32 %v2130_v13, %v1648_v12 }
  0x42   :  { %v216_v18 = vld.sshfl [vmem:[#allocation1 + $0x20] sm:$0xff pattern:$0x73625140]  ;;  %939 = vmatpush.bf16.msrb.mxu0 %v2562_v4  ;;  %v219_v10 = vld.sshfl [vmem:[#allocation1 + $0x38] sm:$0xff pattern:$0x73625140]  ;;  %v2592_v62 = vor.u32 %v2146_v52, %v1712_v28  ;;  %v2597_v36 = vpack.c.bf16 %v218_v47, %v218_v47 }
  0x43   :  { %v217_v9 = vld.sshfl [vmem:[#allocation1 + $0x28] sm:$0xff pattern:$0x73625140]  ;;  %952 = vmatpush.bf16.msrb.mxu1 %v2566_v14  ;;  %3203 = vst [vmem:[#allocation43_spill] sm:$0xff] %v2583_v11  ;;  %v2162_v39 = vld [vmem:[#allocation2 + $0x1f4] sm:$0xf]  ;;  %v2601_v12 = vpack.c.bf16 %v216_v18, %v216_v18  ;;  %v2603_v25 = vpack.c.bf16 %v219_v10, %v219_v10 }
  0x44   :  { %965 = vmatpush.bf16.msrb.mxu2 %v2568_v35  ;;  %v1776_v58 = vld [vmem:[#allocation2 + $0x1f8] sm:$0xf0]  ;;  %1226 = vst [vmem:[#allocation1 + $0x20] ss:$4 sm:$0xff] %v1221_v54  ;;  %v2112_v14 = vld [vmem:[#allocation2 + $0x64] sm:$0xf]  ;;  %v2609_v61 = vpack.c.bf16 %v217_v9, %v217_v9 }
  0x45   :  { %978 = vmatpush.bf16.msrb.mxu3 %v2571_v48  ;;  %3204 = vst [vmem:[#allocation44_spill] sm:$0xff] %v2586_v46  ;;  %v1576_v21 = vld [vmem:[#allocation2 + $0x68] sm:$0xf0]  ;;  %v2128_v35 = vld [vmem:[#allocation2 + $0xe4] sm:$0xf]  ;;  %v2595_v1 = vor.u32 %v2162_v39, %v1776_v58 }
  0x46   :  { %3205 = vst [vmem:[#allocation45_spill] sm:$0xff] %v2588_v34  ;;  %940 = vmatpush.bf16.msrb.mxu0 %v2577_v50  ;;  %v1640_v54 = vld [vmem:[#allocation2 + $0xe8] sm:$0xf0]  ;;  %v2144_v15 = vld [vmem:[#allocation2 + $0x164] sm:$0xf]  ;;  %v2607_v58 = vor.u32 %v2112_v14, %v1576_v21 }
  0x47   :  { %3206 = vst [vmem:[#allocation46_spill] sm:$0xff] %v2590_v38  ;;  %v1704_v40 = vld [vmem:[#allocation2 + $0x168] sm:$0xf0]  ;;  %953 = vmatpush.bf16.msrb.mxu1 %v2581_v53  ;;  %v2160_v28 = vld [vmem:[#allocation2 + $0x1e4] sm:$0xf]  ;;  %v2613_v22 = vor.u32 %v2128_v35, %v1640_v54 }
  0x48   :  { %3207 = vst [vmem:[#allocation47_spill] sm:$0xff] %v2592_v62  ;;  %966 = vmatpush.bf16.msrb.mxu2 %v2583_v11  ;;  %v1768_v52 = vld [vmem:[#allocation2 + $0x1e8] sm:$0xf0]  ;;  %v2615_v39 = vor.u32 %v2144_v15, %v1704_v40  ;;  %v2110_v37 = vld [vmem:[#allocation2 + $0x54] sm:$0xf] }
  0x49   :  { %3208 = vst [vmem:[#allocation48_spill] sm:$0xff] %v2595_v1  ;;  %979 = vmatpush.bf16.msrb.mxu3 %v2586_v46  ;;  %v1568_v13 = vld [vmem:[#allocation2 + $0x58] sm:$0xf0]  ;;  %v2126_v47 = vld [vmem:[#allocation2 + $0xd4] sm:$0xf]  ;;  %v2619_v18 = vor.u32 %v2160_v28, %v1768_v52  ;;  %941 = vmatmul.bf16.vlgmr.msrb.gmra.mxu0 %v2601_v12 }
  0x4a   :  { %985 = vmatpush.bf16.msra.mxu0 %v2588_v34  ;;  %3209 = vst [vmem:[#allocation49_spill] sm:$0xff] %v2607_v58  ;;  %v1632_v21 = vld [vmem:[#allocation2 + $0xd8] sm:$0xf0]  ;;  %v2142_v9 = vld [vmem:[#allocation2 + $0x154] sm:$0xf]  ;;  %954 = vmatmul.bf16.vlgmr.msrb.gmra.mxu1 %v2609_v61  ;;  %v2625_v54 = vor.u32 %v2110_v37, %v1568_v13 }
  0x4b   :  { %998 = vmatpush.bf16.msra.mxu1 %v2590_v38  ;;  %3210 = vst [vmem:[#allocation50_spill] sm:$0xff] %v2613_v22  ;;  %967 = vmatmul.bf16.vlgmr.msrb.gmra.mxu2 %v2597_v36  ;;  %v1696_v14 = vld [vmem:[#allocation2 + $0x158] sm:$0xf0]  ;;  %v2158_v35 = vld [vmem:[#allocation2 + $0x1d4] sm:$0xf]  ;;  %v2629_v15 = vor.u32 %v2126_v47, %v1632_v21 }
  0x4c   :  { %1011 = vmatpush.bf16.msra.mxu2 %v2592_v62  ;;  %3211 = vst [vmem:[#allocation51_spill] sm:$0xff] %v2615_v39  ;;  %980 = vmatmul.bf16.vlgmr.msrb.gmra.mxu3 %v2603_v25  ;;  %v1760_v10 = vld [vmem:[#allocation2 + $0x1d8] sm:$0xf0]  ;;  %v2631_v40 = vor.u32 %v2142_v9, %v1696_v14  ;;  %v2108_v28 = vld [vmem:[#allocation2 + $0x44] sm:$0xf] }
  0x4d   :  { %1024 = vmatpush.bf16.msra.mxu3 %v2595_v1  ;;  %3212 = vst [vmem:[#allocation52_spill] sm:$0xff] %v2619_v18  ;;  %v1560_v52 = vld [vmem:[#allocation2 + $0x48] sm:$0xf0]  ;;  %v2124_v1 = vld [vmem:[#allocation2 + $0xc4] sm:$0xf]  ;;  %v2634_v46 = vor.u32 %v2158_v35, %v1760_v10 }
  0x4e   :  { %986 = vmatpush.bf16.msra.mxu0 %v2607_v58  ;;  %3213 = vst [vmem:[#allocation53_spill] sm:$0xff] %v2625_v54  ;;  %v1624_v48 = vld [vmem:[#allocation2 + $0xc8] sm:$0xf0]  ;;  %v2140_v62 = vld [vmem:[#allocation2 + $0x144] sm:$0xf] }
  0x4f   :  { %999 = vmatpush.bf16.msra.mxu1 %v2613_v22  ;;  %3214 = vst [vmem:[#allocation54_spill] sm:$0xff] %v2629_v15  ;;  %v1688_v58 = vld [vmem:[#allocation2 + $0x148] sm:$0xf0]  ;;  %v2156_v37 = vld [vmem:[#allocation2 + $0x1c4] sm:$0xf]  ;;  %v2637_v22 = vor.u32 %v2108_v28, %v1560_v52  ;;  %v2641_v47 = vor.u32 %v2124_v1, %v1624_v48 }
  0x50   :  { %1012 = vmatpush.bf16.msra.mxu2 %v2615_v39  ;;  %3215 = vst [vmem:[#allocation55_spill] sm:$0xff] %v2631_v40  ;;  %v1752_v13 = vld [vmem:[#allocation2 + $0x1c8] sm:$0xf0]  ;;  %v2643_v21 = vor.u32 %v2140_v62, %v1688_v58  ;;  %v2106_v9 = vld [vmem:[#allocation2 + $0x34] sm:$0xf] }
  0x51   :  { %1025 = vmatpush.bf16.msra.mxu3 %v2619_v18  ;;  %3216 = vst [vmem:[#allocation56_spill] sm:$0xff] %v2634_v46  ;;  %v1552_v14 = vld [vmem:[#allocation2 + $0x38] sm:$0xf0]  ;;  %v2122_v35 = vld [vmem:[#allocation2 + $0xb4] sm:$0xf]  ;;  %v2646_v10 = vor.u32 %v2156_v37, %v1752_v13 }
  0x52   :  { %987 = vmatpush.bf16.msra.mxu0 %v2625_v54  ;;  %3217 = vst [vmem:[#allocation57_spill] sm:$0xff] %v2637_v22  ;;  %v1616_v18 = vld [vmem:[#allocation2 + $0xb8] sm:$0xf0]  ;;  %v2138_v39 = vld [vmem:[#allocation2 + $0x134] sm:$0xf] }
  0x53   :  { %1000 = vmatpush.bf16.msra.mxu1 %v2629_v15  ;;  %3218 = vst [vmem:[#allocation58_spill] sm:$0xff] %v2641_v47  ;;  %v1680_v54 = vld [vmem:[#allocation2 + $0x138] sm:$0xf0]  ;;  %v2154_v28 = vld [vmem:[#allocation2 + $0x1b4] sm:$0xf]  ;;  %v2649_v15 = vor.u32 %v2106_v9, %v1552_v14  ;;  %v2653_v48 = vor.u32 %v2122_v35, %v1616_v18 }
  0x54   :  { %1013 = vmatpush.bf16.msra.mxu2 %v2631_v40  ;;  %3219 = vst [vmem:[#allocation59_spill] sm:$0xff] %v2643_v21  ;;  %v1744_v52 = vld [vmem:[#allocation2 + $0x1b8] sm:$0xf0]  ;;  %v2655_v62 = vor.u32 %v2138_v39, %v1680_v54  ;;  %v2104_v1 = vld [vmem:[#allocation2 + $0x24] sm:$0xf] }
  0x55   :  { %1026 = vmatpush.bf16.msra.mxu3 %v2634_v46  ;;  %3220 = vst [vmem:[#allocation60_spill] sm:$0xff] %v2646_v10  ;;  %v1544_v58 = vld [vmem:[#allocation2 + $0x28] sm:$0xf0]  ;;  %v2120_v37 = vld [vmem:[#allocation2 + $0xa4] sm:$0xf]  ;;  %v2658_v13 = vor.u32 %v2154_v28, %v1744_v52 }
  0x56   :  { %988 = vmatpush.bf16.msra.mxu0 %v2637_v22  ;;  %3221 = vst [vmem:[#allocation61_spill] sm:$0xff] %v2649_v15  ;;  %v1608_v46 = vld [vmem:[#allocation2 + $0xa8] sm:$0xf0]  ;;  %v2136_v40 = vld [vmem:[#allocation2 + $0x124] sm:$0xf] }
  0x57   :  { %1001 = vmatpush.bf16.msra.mxu1 %v2641_v47  ;;  %3222 = vst [vmem:[#allocation62_spill] sm:$0xff] %v2653_v48  ;;  %v1672_v22 = vld [vmem:[#allocation2 + $0x128] sm:$0xf0]  ;;  %v2152_v9 = vld [vmem:[#allocation2 + $0x1a4] sm:$0xf]  ;;  %v2661_v47 = vor.u32 %v2104_v1, %v1544_v58  ;;  %v2665_v39 = vor.u32 %v2120_v37, %v1608_v46 }
  0x58   :  { %1014 = vmatpush.bf16.msra.mxu2 %v2643_v21  ;;  %3223 = vst [vmem:[#allocation63_spill] sm:$0xff] %v2655_v62  ;;  %v1736_v14 = vld [vmem:[#allocation2 + $0x1a8] sm:$0xf0]  ;;  %v2667_v18 = vor.u32 %v2136_v40, %v1672_v22  ;;  %v2102_v54 = vld [vmem:[#allocation2 + $0x14] sm:$0xf] }
  0x59   :  { %1027 = vmatpush.bf16.msra.mxu3 %v2646_v10  ;;  %3224 = vst [vmem:[#allocation64_spill] sm:$0xff] %v2658_v13  ;;  %v1536_v35 = vld [vmem:[#allocation2 + $0x18] sm:$0xf0]  ;;  %v2118_v28 = vld [vmem:[#allocation2 + $0x94] sm:$0xf]  ;;  %v2670_v52 = vor.u32 %v2152_v9, %v1736_v14 }
  0x5a   :  { %989 = vmatpush.bf16.msra.mxu0 %v2649_v15  ;;  %3225 = vst [vmem:[#allocation65_spill] sm:$0xff] %v2661_v47  ;;  %v1600_v10 = vld [vmem:[#allocation2 + $0x98] sm:$0xf0]  ;;  %v2134_v21 = vld [vmem:[#allocation2 + $0x114] sm:$0xf] }
  0x5b   :  { %1002 = vmatpush.bf16.msra.mxu1 %v2653_v48  ;;  %3226 = vst [vmem:[#allocation66_spill] sm:$0xff] %v2665_v39  ;;  %v1664_v15 = vld [vmem:[#allocation2 + $0x118] sm:$0xf0]  ;;  %v2150_v1 = vld [vmem:[#allocation2 + $0x194] sm:$0xf]  ;;  %v2673_v48 = vor.u32 %v2102_v54, %v1536_v35  ;;  %v2677_v22 = vor.u32 %v2118_v28, %v1600_v10 }
  0x5c   :  { %1015 = vmatpush.bf16.msra.mxu2 %v2655_v62  ;;  %3227 = vst [vmem:[#allocation67_spill] sm:$0xff] %v2667_v18  ;;  %v1728_v58 = vld [vmem:[#allocation2 + $0x198] sm:$0xf0]  ;;  %v2100_v46 = vld [vmem:[#allocation2 + $0x4] sm:$0xf]  ;;  %v2679_v40 = vor.u32 %v2134_v21, %v1664_v15 }
  0x5d   :  { %1028 = vmatpush.bf16.msra.mxu3 %v2658_v13  ;;  %3228 = vst [vmem:[#allocation68_spill] sm:$0xff] %v2670_v52  ;;  %v1528_v37 = vld [vmem:[#allocation2 + $0x8] sm:$0xf0]  ;;  %v2116_v9 = vld [vmem:[#allocation2 + $0x84] sm:$0xf]  ;;  %v2682_v62 = vor.u32 %v2150_v1, %v1728_v58 }
  0x5e   :  { %990 = vmatpush.bf16.msra.mxu0 %v2661_v47  ;;  %3229 = vst [vmem:[#allocation69_spill] sm:$0xff] %v2673_v48  ;;  %v1592_v14 = vld [vmem:[#allocation2 + $0x88] sm:$0xf0]  ;;  %v2132_v13 = vld [vmem:[#allocation2 + $0x104] sm:$0xf] }
  0x5f   :  { %1003 = vmatpush.bf16.msra.mxu1 %v2665_v39  ;;  %3230 = vst [vmem:[#allocation70_spill] sm:$0xff] %v2677_v22  ;;  %v1656_v47 = vld [vmem:[#allocation2 + $0x108] sm:$0xf0]  ;;  %v2148_v54 = vld [vmem:[#allocation2 + $0x184] sm:$0xf]  ;;  %v2689_v28 = vor.u32 %v2116_v9, %v1592_v14 }
  0x60   :  { %1016 = vmatpush.bf16.msra.mxu2 %v2667_v18  ;;  %3231 = vst [vmem:[#allocation71_spill] sm:$0xff] %v2682_v62  ;;  %v1720_v35 = vld [vmem:[#allocation2 + $0x188] sm:$0xf0]  ;;  %v2178_v38 = vld [vmem:[#allocation2 + $0x274] sm:$0xf]  ;;  %v2685_v18 = vor.u32 %v2100_v46, %v1528_v37  ;;  %v2691_v1 = vor.u32 %v2132_v13, %v1656_v47 }
  0x61   :  { %1029 = vmatpush.bf16.msra.mxu3 %v2670_v52  ;;  %v1840_v34 = vld [vmem:[#allocation2 + $0x278] sm:$0xf0]  ;;  %v2194_v11 = vld [vmem:[#allocation2 + $0x2f4] sm:$0xf]  ;;  %v2694_v39 = vor.u32 %v2148_v54, %v1720_v35  ;;  %v2176_v53 = vld [vmem:[#allocation2 + $0x264] sm:$0xf] }
  0x62   :  { %991 = vmatpush.bf16.msra.mxu0 %v2673_v48  ;;  %v1904_v10 = vld [vmem:[#allocation2 + $0x2f8] sm:$0xf0]  ;;  %v2210_v15 = vld [vmem:[#allocation2 + $0x374] sm:$0xf]  ;;  %v2696_v48 = vor.u32 %v2178_v38, %v1840_v34  ;;  %v2192_v50 = vld [vmem:[#allocation2 + $0x2e4] sm:$0xf] }
  0x63   :  { %v1968_v21 = vld [vmem:[#allocation2 + $0x378] sm:$0xf0]  ;;  %1004 = vmatpush.bf16.msra.mxu1 %v2677_v22  ;;  %v2226_v58 = vld [vmem:[#allocation2 + $0x3f4] sm:$0xf]  ;;  %3232 = vst [vmem:[#allocation72_spill] sm:$0xff] %v2694_v39  ;;  %v2698_v46 = vor.u32 %v2194_v11, %v1904_v10 }
  0x64   :  { %1017 = vmatpush.bf16.msra.mxu2 %v2679_v40  ;;  %v2032_v52 = vld [vmem:[#allocation2 + $0x3f8] sm:$0xf0]  ;;  %v2700_v37 = vor.u32 %v2210_v15, %v1968_v21  ;;  %v1832_v22 = vld [vmem:[#allocation2 + $0x268] sm:$0xf0]  ;;  %v2208_v13 = vld [vmem:[#allocation2 + $0x364] sm:$0xf] }
  0x65   :  { %1030 = vmatpush.bf16.msra.mxu3 %v2682_v62  ;;  %v2703_v9 = vor.u32 %v2226_v58, %v2032_v52  ;;  %v1896_v47 = vld [vmem:[#allocation2 + $0x2e8] sm:$0xf0]  ;;  %v2224_v34 = vld [vmem:[#allocation2 + $0x3e4] sm:$0xf]  ;;  %v2709_v11 = vor.u32 %v2176_v53, %v1832_v22  ;;  %v2174_v35 = vld [vmem:[#allocation2 + $0x254] sm:$0xf] }
  0x66   :  { %3233 = vst [vmem:[#allocation73_spill] sm:$0xff] %v2700_v37  ;;  %992 = vmatpush.bf16.msra.mxu0 %v2685_v18  ;;  %v1960_v14 = vld [vmem:[#allocation2 + $0x368] sm:$0xf0]  ;;  %v2713_v52 = vor.u32 %v2192_v50, %v1896_v47  ;;  %v1824_v10 = vld [vmem:[#allocation2 + $0x258] sm:$0xf0] }
  0x67   :  { %3234 = vst [vmem:[#allocation74_spill] sm:$0xff] %v2703_v9  ;;  %1005 = vmatpush.bf16.msra.mxu1 %v2689_v28  ;;  %v2024_v38 = vld [vmem:[#allocation2 + $0x3e8] sm:$0xf0]  ;;  %v2715_v54 = vor.u32 %v2208_v13, %v1960_v14  ;;  %v2190_v15 = vld [vmem:[#allocation2 + $0x2d4] sm:$0xf]  ;;  %v2724_v50 = vor.u32 %v2174_v35, %v1824_v10 }
  0x68   :  { %1018 = vmatpush.bf16.msra.mxu2 %v2691_v1  ;;  %v2718_v21 = vor.u32 %v2224_v34, %v2024_v38  ;;  %v1888_v58 = vld [vmem:[#allocation2 + $0x2d8] sm:$0xf0]  ;;  %v2206_v53 = vld [vmem:[#allocation2 + $0x354] sm:$0xf]  ;;  %v2172_v13 = vld [vmem:[#allocation2 + $0x244] sm:$0xf] }
  0x69   :  { %1031 = vmatpush.bf16.msra.mxu3 %v2694_v39  ;;  %3235 = vst [vmem:[#allocation75_spill] sm:$0xff] %v2715_v54  ;;  %v1952_v22 = vld [vmem:[#allocation2 + $0x358] sm:$0xf0]  ;;  %v2222_v39 = vld [vmem:[#allocation2 + $0x3d4] sm:$0xf]  ;;  %993 = vmatmul.bf16.vlgmr.msra.gmra.mxu0 %v2517_v32 }
  0x6a   :  { %1037 = vmatpush.bf16.msrb.mxu0 %v2696_v48  ;;  %3236 = vst [vmem:[#allocation76_spill] sm:$0xff] %v2718_v21  ;;  %v2016_v62 = vld [vmem:[#allocation2 + $0x3d8] sm:$0xf0]  ;;  %1006 = vmatmul.bf16.vlgmr.msra.gmra.mxu1 %v2525_v42  ;;  %v2731_v47 = vor.u32 %v2206_v53, %v1952_v22  ;;  %v1816_v14 = vld [vmem:[#allocation2 + $0x248] sm:$0xf0] }
  0x6b   :  { %1050 = vmatpush.bf16.msrb.mxu1 %v2698_v46  ;;  %1019 = vmatmul.bf16.vlgmr.msra.gmra.mxu2 %v2515_v30  ;;  %v2729_v30 = vor.u32 %v2190_v15, %v1888_v58  ;;  %v2188_v34 = vld [vmem:[#allocation2 + $0x2c4] sm:$0xf]  ;;  %v1880_v32 = vld [vmem:[#allocation2 + $0x2c8] sm:$0xf0]  ;;  %v2170_v53 = vld [vmem:[#allocation2 + $0x234] sm:$0xf] }
  0x6c   :  { %1063 = vmatpush.bf16.msrb.mxu2 %v2700_v37  ;;  %1032 = vmatmul.bf16.vlgmr.msra.gmra.mxu3 %v2523_v2  ;;  %3238 = vst [vmem:[#allocation78_spill] sm:$0xff] %v2731_v47  ;;  %v2734_v2 = vor.u32 %v2222_v39, %v2016_v62  ;;  %v2204_v38 = vld [vmem:[#allocation2 + $0x344] sm:$0xf]  ;;  %v1944_v35 = vld [vmem:[#allocation2 + $0x348] sm:$0xf0]  ;;  %v2741_v15 = vor.u32 %v2188_v34, %v1880_v32 }
  0x6d   :  { %1076 = vmatpush.bf16.msrb.mxu3 %v2703_v9  ;;  %3237 = vst [vmem:[#allocation77_spill] sm:$0xff] %v2729_v30  ;;  %v2220_v10 = vld [vmem:[#allocation2 + $0x3c4] sm:$0xf]  ;;  %v2008_v42 = vld [vmem:[#allocation2 + $0x3c8] sm:$0xf0]  ;;  %v2737_v9 = vor.u32 %v2172_v13, %v1816_v14  ;;  %v2743_v58 = vor.u32 %v2204_v38, %v1944_v35 }
  0x6e   :  { %1038 = vmatpush.bf16.msrb.mxu0 %v2709_v11  ;;  %3239 = vst [vmem:[#allocation79_spill] sm:$0xff] %v2734_v2  ;;  %v1808_v62 = vld [vmem:[#allocation2 + $0x238] sm:$0xf0]  ;;  %v2186_v39 = vld [vmem:[#allocation2 + $0x2b4] sm:$0xf]  ;;  %v2746_v22 = vor.u32 %v2220_v10, %v2008_v42 }
  0x6f   :  { %1051 = vmatpush.bf16.msrb.mxu1 %v2713_v52  ;;  %3240 = vst [vmem:[#allocation80_spill] sm:$0xff] %v2737_v9  ;;  %v1936_v37 = vld [vmem:[#allocation2 + $0x338] sm:$0xf0]  ;;  %v2218_v13 = vld [vmem:[#allocation2 + $0x3b4] sm:$0xf] }
  0x70   :  { %1064 = vmatpush.bf16.msrb.mxu2 %v2715_v54  ;;  %3241 = vst [vmem:[#allocation81_spill] sm:$0xff] %v2741_v15  ;;  %v2202_v54 = vld [vmem:[#allocation2 + $0x334] sm:$0xf]  ;;  %v2000_v14 = vld [vmem:[#allocation2 + $0x3b8] sm:$0xf0] }
  0x71   :  { %1077 = vmatpush.bf16.msrb.mxu3 %v2718_v21  ;;  %3242 = vst [vmem:[#allocation82_spill] sm:$0xff] %v2743_v58  ;;  %v1872_v21 = vld [vmem:[#allocation2 + $0x2b8] sm:$0xf0]  ;;  %v2755_v32 = vor.u32 %v2202_v54, %v1936_v37  ;;  %v2168_v38 = vld [vmem:[#allocation2 + $0x224] sm:$0xf]  ;;  %v2758_v42 = vor.u32 %v2218_v13, %v2000_v14 }
  0x72   :  { %1039 = vmatpush.bf16.msrb.mxu0 %v2724_v50  ;;  %3243 = vst [vmem:[#allocation83_spill] sm:$0xff] %v2746_v22  ;;  %v2753_v34 = vor.u32 %v2186_v39, %v1872_v21  ;;  %v1800_v35 = vld [vmem:[#allocation2 + $0x228] sm:$0xf0]  ;;  %v2184_v10 = vld [vmem:[#allocation2 + $0x2a4] sm:$0xf] }
  0x73   :  { %1052 = vmatpush.bf16.msrb.mxu1 %v2729_v30  ;;  %v2749_v30 = vor.u32 %v2170_v53, %v1808_v62  ;;  %3246 = vst [vmem:[#allocation86_spill] sm:$0xff] %v2755_v32  ;;  %v2216_v53 = vld [vmem:[#allocation2 + $0x3a4] sm:$0xf]  ;;  %v1992_v62 = vld [vmem:[#allocation2 + $0x3a8] sm:$0xf0] }
  0x74   :  { %1065 = vmatpush.bf16.msrb.mxu2 %v2731_v47  ;;  %3245 = vst [vmem:[#allocation85_spill] sm:$0xff] %v2753_v34  ;;  %v2200_v47 = vld [vmem:[#allocation2 + $0x324] sm:$0xf]  ;;  %v2166_v21 = vld [vmem:[#allocation2 + $0x214] sm:$0xf]  ;;  %v2770_v14 = vor.u32 %v2216_v53, %v1992_v62 }
  0x75   :  { %1078 = vmatpush.bf16.msrb.mxu3 %v2734_v2  ;;  %3244 = vst [vmem:[#allocation84_spill] sm:$0xff] %v2749_v30  ;;  %v1864_v2 = vld [vmem:[#allocation2 + $0x2a8] sm:$0xf0]  ;;  %v1792_v39 = vld [vmem:[#allocation2 + $0x218] sm:$0xf0] }
  0x76   :  { %1040 = vmatpush.bf16.msrb.mxu0 %v2737_v9  ;;  %3247 = vst [vmem:[#allocation87_spill] sm:$0xff] %v2758_v42  ;;  %v1928_v9 = vld [vmem:[#allocation2 + $0x328] sm:$0xf0]  ;;  %v2765_v37 = vor.u32 %v2184_v10, %v1864_v2  ;;  %v2182_v13 = vld [vmem:[#allocation2 + $0x294] sm:$0xf] }
  0x77   :  { %1053 = vmatpush.bf16.msrb.mxu1 %v2741_v15  ;;  %v2761_v15 = vor.u32 %v2168_v38, %v1800_v35  ;;  %v2767_v54 = vor.u32 %v2200_v47, %v1928_v9  ;;  %v2214_v38 = vld [vmem:[#allocation2 + $0x394] sm:$0xf]  ;;  %v1984_v35 = vld [vmem:[#allocation2 + $0x398] sm:$0xf0]  ;;  %v2164_v2 = vld [vmem:[#allocation2 + $0x204] sm:$0xf] }
  0x78   :  { %1066 = vmatpush.bf16.msrb.mxu2 %v2743_v58  ;;  %3249 = vst [vmem:[#allocation89_spill] sm:$0xff] %v2765_v37  ;;  %v2198_v58 = vld [vmem:[#allocation2 + $0x314] sm:$0xf]  ;;  %v1784_v10 = vld [vmem:[#allocation2 + $0x208] sm:$0xf0]  ;;  %v2782_v62 = vor.u32 %v2214_v38, %v1984_v35 }
  0x79   :  { %1079 = vmatpush.bf16.msrb.mxu3 %v2746_v22  ;;  %3248 = vst [vmem:[#allocation88_spill] sm:$0xff] %v2761_v15  ;;  %v1856_v22 = vld [vmem:[#allocation2 + $0x298] sm:$0xf0]  ;;  %v2180_v53 = vld [vmem:[#allocation2 + $0x284] sm:$0xf]  ;;  %v3257_v35 = vld [vmem:[#allocation20_spill] sm:$0xff] }
  0x7a   :  { %1041 = vmatpush.bf16.msrb.mxu0 %v2749_v30  ;;  %v1920_v30 = vld [vmem:[#allocation2 + $0x318] sm:$0xf0]  ;;  %v2777_v9 = vor.u32 %v2182_v13, %v1856_v22  ;;  %v2799_v13 = vld [vmem:[%s3088_s4 + $0x38] sm:$0xff] }
  0x7b   :  { %1054 = vmatpush.bf16.msrb.mxu1 %v2753_v34  ;;  %v2773_v34 = vor.u32 %v2166_v21, %v1792_v39  ;;  %v2779_v47 = vor.u32 %v2198_v58, %v1920_v30  ;;  %v2212_v21 = vld [vmem:[#allocation2 + $0x384] sm:$0xf]  ;;  %v1976_v39 = vld [vmem:[#allocation2 + $0x388] sm:$0xf0] }
  0x7c   :  { %1067 = vmatpush.bf16.msrb.mxu2 %v2755_v32  ;;  %v2196_v32 = vld [vmem:[#allocation2 + $0x304] sm:$0xf]  ;;  %v2794_v22 = vor.u32 %v2212_v21, %v1976_v39  ;;  %v3258_v39 = vld [vmem:[#allocation22_spill] sm:$0xff] }
  0x7d   :  { %1080 = vmatpush.bf16.msrb.mxu3 %v2758_v42  ;;  %v1848_v42 = vld [vmem:[#allocation2 + $0x288] sm:$0xf0] }
  0x7e   :  { %1042 = vmatpush.bf16.msrb.mxu0 %v2761_v15  ;;  %v1912_v15 = vld [vmem:[#allocation2 + $0x308] sm:$0xf0]  ;;  %v2789_v30 = vor.u32 %v2180_v53, %v1848_v42 }
  0x7f   :  { %1055 = vmatpush.bf16.msrb.mxu1 %v2765_v37  ;;  %v2785_v37 = vor.u32 %v2164_v2, %v1784_v10  ;;  %v2791_v58 = vor.u32 %v2196_v32, %v1912_v15  ;;  %v2930_v15 = vld [vmem:[%s3088_s4 + $0x50] sm:$0xff]  ;;  %v2937_v2 = vld [vmem:[%s3088_s4 + $0x48] sm:$0xff] }
  0x80   :  { %1068 = vmatpush.bf16.msrb.mxu2 %v2767_v54 }
  0x81   :  { %1081 = vmatpush.bf16.msrb.mxu3 %v2770_v14 }
  0x82   :  { %1043 = vmatpush.bf16.msrb.mxu0 %v2773_v34 }
  0x83   :  { %1056 = vmatpush.bf16.msrb.mxu1 %v2777_v9 }
  0x84   :  { %1069 = vmatpush.bf16.msrb.mxu2 %v2779_v47 }
  0x85   :  { %1082 = vmatpush.bf16.msrb.mxu3 %v2782_v62 }
  0x86   :  { %1044 = vmatpush.bf16.msrb.mxu0 %v2785_v37 }
  0x87   :  { %1057 = vmatpush.bf16.msrb.mxu1 %v2789_v30 }
  0x88   :  { %1070 = vmatpush.bf16.msrb.mxu2 %v2791_v58 }
  0x89   :  { %1083 = vmatpush.bf16.msrb.mxu3 %v2794_v22  ;;  %1045 = vmatmul.bf16.vlgmr.msrb.gmra.mxu0 %v2601_v12 }
  0x8a   :  { %1192 = vmatpush.bf16.msra.mxu0 %v2799_v13  ;;  %1058 = vmatmul.bf16.vlgmr.msrb.gmra.mxu1 %v2609_v61 }
  0x8b   :  { %1071 = vmatmul.bf16.vlgmr.msrb.gmra.mxu2 %v2597_v36  ;;  %v2923_v36 = vld [vmem:[%s3088_s4 + $0x58] sm:$0xff] }
  0x8c   :  { %1251 = vmatpush.bf16.msra.mxu2 %v2376_v3  ;;  %1084 = vmatmul.bf16.vlgmr.msrb.gmra.mxu3 %v2603_v25  ;;  %v2821_v3 = vld [vmem:[%s3088_s4 + $0x30] sm:$0xff]  ;;  %v3256_v25 = vld [vmem:[#allocation18_spill] sm:$0xff] }
  0x8d   :  { %1264 = vmatpush.bf16.msra.mxu3 %v2378_v7  ;;  %v2830_v7 = vld [vmem:[%s3088_s4 + $0x28] sm:$0xff] }
  0x8e   :  { %1193 = vmatpush.bf16.msra.mxu0 %v2821_v3 }
  0x90   :  { %1252 = vmatpush.bf16.msra.mxu2 %v2387_v16  ;;  %v2836_v16 = vld [vmem:[%s3088_s4 + $0x20] sm:$0xff] }
  0x91   :  { %1265 = vmatpush.bf16.msra.mxu3 %v2389_v17  ;;  %v2844_v17 = vld [vmem:[%s3088_s4 + $0x18] sm:$0xff] }
  0x92   :  { %1194 = vmatpush.bf16.msra.mxu0 %v2830_v7 }
  0x94   :  { %1253 = vmatpush.bf16.msra.mxu2 %v2397_v29  ;;  %v2858_v29 = vld [vmem:[%s3088_s4 + $0x10] sm:$0xff] }
  0x95   :  { %1266 = vmatpush.bf16.msra.mxu3 %v2401_v33  ;;  %v2866_v33 = vld [vmem:[%s3088_s4 + $0x8] sm:$0xff] }
  0x96   :  { %1195 = vmatpush.bf16.msra.mxu0 %v2836_v16 }
  0x98   :  { %1254 = vmatpush.bf16.msra.mxu2 %v2409_v44  ;;  %v2872_v44 = vld [vmem:[%s3087_s3] sm:$0x3] }
  0x99   :  { %1267 = vmatpush.bf16.msra.mxu3 %v2413_v45 }
  0x9a   :  { %1196 = vmatpush.bf16.msra.mxu0 %v2844_v17 }
  0x9c   :  { %1255 = vmatpush.bf16.msra.mxu2 %v2421_v56 }
  0x9d   :  { %1268 = vmatpush.bf16.msra.mxu3 %v2425_v57  ;;  %v2879_v57 = vld [vmem:[%s3088_s4] sm:$0xff] }
  0x9e   :  { %1197 = vmatpush.bf16.msra.mxu0 %v2858_v29 }
  0xa0   :  { %1256 = vmatpush.bf16.msra.mxu2 %v2433_v5  ;;  %v237_v5 = vperm.slane %v2872_v44, 0 }
  0xa1   :  { %1269 = vmatpush.bf16.msra.mxu3 %v2437_v6  ;;  %v2887_v6 = vld [vmem:[%s3088_s4 + $0x78] sm:$0xff] }
  0xa2   :  { %1198 = vmatpush.bf16.msra.mxu0 %v2866_v33  ;;  %1205 = vmatpush.bf16.msra.mxu1 %v2887_v6 }
  0xa4   :  { %1257 = vmatpush.bf16.msra.mxu2 %v2445_v23 }
  0xa5   :  { %1270 = vmatpush.bf16.msra.mxu3 %v2449_v27 }
  0xa6   :  { %1199 = vmatpush.bf16.msra.mxu0 %v2879_v57 }
  0xa8   :  { %1258 = vmatpush.bf16.msra.mxu2 %v2457_v43  ;;  %v2895_v43 = vld [vmem:[%s3088_s4 + $0x70] sm:$0xff] }
  0xa9   :  { %1271 = vmatpush.bf16.msra.mxu3 %v2461_v51  ;;  %1206 = vmatpush.bf16.msra.mxu1 %v2895_v43 }
  0xaa   :  { %1277 = vmatpush.bf16.msrb.mxu0 %v2380_v8  ;;  %v2906_v8 = vld [vmem:[%s3088_s4 + $0x68] sm:$0xff] }
  0xac   :  { %1303 = vmatpush.bf16.msrb.mxu2 %v2468_v59 }
  0xad   :  { %1316 = vmatpush.bf16.msrb.mxu3 %v2470_v60  ;;  %1207 = vmatpush.bf16.msra.mxu1 %v2906_v8 }
  0xb0   :  { %1304 = vmatpush.bf16.msrb.mxu2 %v2484_v19  ;;  %v890_v45 = vpop.f32.mrf.mxu0  ;;  %v3250_v19 = vld [vmem:[#allocation12_spill] sm:$0xff] }
  0xb1   :  { %1317 = vmatpush.bf16.msrb.mxu3 %v2488_v20  ;;  %v891_v51 = vadd.f32 %v890_v45, %v237_v5  ;;  %1278 = vmatpush.bf16.msrb.mxu0 %v3250_v19 }
  0xb2   :  { %v903_v56 = vpop.f32.mrf.mxu1 }
  0xb3   :  { %v904_v20 = vadd.f32 %v903_v56, %v891_v51 }
  0xb4   :  { %1305 = vmatpush.bf16.msrb.mxu2 %v2496_v41  ;;  %v3251_v41 = vld [vmem:[#allocation38_spill] sm:$0xff] }
  0xb5   :  { %1318 = vmatpush.bf16.msrb.mxu3 %v2500_v49  ;;  %v916_v23 = vpop.f32.mrf.mxu2  ;;  %v3252_v49 = vld [vmem:[#allocation41_spill] sm:$0xff] }
  0xb7   :  { %v929_v27 = vpop.f32.mrf.mxu3 }
  0xb8   :  { %1306 = vmatpush.bf16.msrb.mxu2 %v2511_v24  ;;  %v892_v59 = vpop.f32.mrf.mxu0 }
  0xb9   :  { %1319 = vmatpush.bf16.msrb.mxu3 %v2513_v26  ;;  %v3253_v26 = vld [vmem:[#allocation14_spill] sm:$0xff]  ;;  %v3259_v59 = vld [vmem:[#allocation24_spill] sm:$0xff] }
  0xba   :  { %v905_v60 = vpop.f32.mrf.mxu1  ;;  %1279 = vmatpush.bf16.msrb.mxu0 %v3253_v26  ;;  %v3263_v26 = vld [vmem:[#allocation28_spill] sm:$0xff] }
  0xbc   :  { %1307 = vmatpush.bf16.msrb.mxu2 %v2534_v63 }
  0xbd   :  { %1320 = vmatpush.bf16.msrb.mxu3 %v2539_v0  ;;  %v918_v24 = vpop.f32.mrf.mxu2  ;;  %v2915_v0 = vld [vmem:[%s3088_s4 + $0x60] sm:$0xff] }
  0xbe   :  { %1208 = vmatpush.bf16.msra.mxu1 %v2915_v0  ;;  %v3262_v24 = vld [vmem:[#allocation13_spill] sm:$0xff] }
  0xbf   :  { %v931_v63 = vpop.f32.mrf.mxu3 }
  0xc0   :  { %1308 = vmatpush.bf16.msrb.mxu2 %v2550_v31  ;;  %v3254_v31 = vld [vmem:[#allocation42_spill] sm:$0xff]  ;;  %v3264_v63 = vld [vmem:[#allocation15_spill] sm:$0xff] }
  0xc1   :  { %1321 = vmatpush.bf16.msrb.mxu3 %v2554_v55  ;;  %v3255_v55 = vld [vmem:[#allocation16_spill] sm:$0xff] }
  0xc2   :  { %1280 = vmatpush.bf16.msrb.mxu0 %v3255_v55  ;;  %1209 = vmatpush.bf16.msra.mxu1 %v2923_v36  ;;  %v3267_v55 = vld [vmem:[#allocation32_spill] sm:$0xff] }
  0xc4   :  { %1309 = vmatpush.bf16.msrb.mxu2 %v2562_v4  ;;  %v917_v4 = vadd.f32 %v916_v23, %v904_v20  ;;  %v2944_v23 = vld [vmem:[%s3088_s4 + $0x40] sm:$0xff]  ;;  %v3260_v20 = vld [vmem:[#allocation11_spill] sm:$0xff] }
  0xc5   :  { %1322 = vmatpush.bf16.msrb.mxu3 %v3251_v41 }
  0xc6   :  { %v930_v12 = vadd.f32 %v929_v27, %v917_v4  ;;  %1281 = vmatpush.bf16.msrb.mxu0 %v3256_v25  ;;  %v942_v61 = vpop.f32.mrf.mxu0  ;;  %1210 = vmatpush.bf16.msra.mxu1 %v2930_v15  ;;  %v3265_v4 = vld [vmem:[#allocation30_spill] sm:$0xff] }
  0xc7   :  { %v955_v42 = vpop.f32.mrf.mxu1 }
  0xc8   :  { %1310 = vmatpush.bf16.msrb.mxu2 %v3252_v49  ;;  %v943_v32 = vadd.f32 %v942_v61, %v930_v12  ;;  %v3261_v49 = vld [vmem:[#allocation26_spill] sm:$0xff]  ;;  %v3268_v12 = vld [vmem:[#allocation19_spill] sm:$0xff] }
  0xc9   :  { %1323 = vmatpush.bf16.msrb.mxu3 %v3254_v31  ;;  %v3266_v31 = vld [vmem:[#allocation17_spill] sm:$0xff] }
  0xca   :  { %v956_v38 = vadd.f32 %v955_v42, %v943_v32  ;;  %1282 = vmatpush.bf16.msrb.mxu0 %v3257_v35  ;;  %1211 = vmatpush.bf16.msra.mxu1 %v2937_v2  ;;  %v3269_v32 = vld [vmem:[#allocation34_spill] sm:$0xff]  ;;  %v3270_v42 = vld [vmem:[#allocation21_spill] sm:$0xff]  ;;  %v3271_v35 = vld [vmem:[#allocation36_spill] sm:$0xff] }
  0xce   :  { %v968_v10 = vpop.f32.mrf.mxu2  ;;  %1283 = vmatpush.bf16.msrb.mxu0 %v3258_v39  ;;  %v944_v56 = vpop.f32.mrf.mxu0  ;;  %1212 = vmatpush.bf16.msra.mxu1 %v2944_v23 }
  0xcf   :  { %v969_v53 = vadd.f32 %v968_v10, %v956_v38  ;;  %v981_v21 = vpop.f32.mrf.mxu3  ;;  %v957_v27 = vpop.f32.mrf.mxu1  ;;  %v3274_v56 = vld [vmem:[#allocation25_spill] sm:$0xff] }
  0xd0   :  { %v238_v27 = vperm.slane %v2872_v44, 1 }
  0xd1   :  { %v982_v45 = vadd.f32 %v981_v21, %v969_v53  ;;  %v3272_v53 = vld [vmem:[#allocation23_spill] sm:$0xff] }
  0xd2   :  { %1284 = vmatpush.bf16.msrb.mxu0 %v3259_v59  ;;  %1290 = vmatpush.bf16.msrb.mxu1 %v3260_v20  ;;  %v1227_v59 = vld.sshfl [vmem:[#allocation1] sm:$0xff pattern:$0x73625140] }
  0xd3   :  { %v1089_v51 = vmax.f32 %v982_v45, 0.0  ;;  %v3273_v45 = vld [vmem:[#allocation39_spill] sm:$0xff]  ;;  %v1243_v20 = vpack.c.bf16 %v1227_v59, %v1227_v59 }
  0xd4   :  { %v1232_v59 = vld.sshfl [vmem:[#allocation1 + $0x28] sm:$0xff pattern:$0x73625140] }
  0xd5   :  { %v1091_v60 = vpack.c.bf16 %v1089_v51, %v1089_v51  ;;  %1259 = vmatmul.bf16.vlgmr.msra.gmra.mxu2 %v1243_v20 }
  0xd6   :  { %v970_v19 = vpop.f32.mrf.mxu2  ;;  %1291 = vmatpush.bf16.msrb.mxu1 %v3262_v24 }
  0xd7   :  { %1200 = vmatmul.bf16.vlgmr.msra.gmra.mxu0 %v1091_v60  ;;  %v983_v41 = vpop.f32.mrf.mxu3  ;;  %v3275_v60 = vld [vmem:[#allocation43_spill] sm:$0xff] }
  0xd8   :  { %1329 = vmatpush.bf16.msra.mxu0 %v3261_v49  ;;  %v1228_v49 = vld.sshfl [vmem:[#allocation1 + $0x8] sm:$0xff pattern:$0x73625140] }
  0xd9   :  { %v1244_v24 = vpack.c.bf16 %v1228_v49, %v1228_v49 }
  0xda   :  { %1292 = vmatpush.bf16.msrb.mxu1 %v3264_v63 }
  0xdb   :  { %1272 = vmatmul.bf16.vlgmr.msra.gmra.mxu3 %v1244_v24 }
  0xdc   :  { %1330 = vmatpush.bf16.msra.mxu0 %v3263_v26  ;;  %v3276_v26 = vld [vmem:[#allocation45_spill] sm:$0xff] }
  0xdd   :  { %1355 = vmatpush.bf16.msra.mxu2 %v3276_v26 }
  0xde   :  { %1293 = vmatpush.bf16.msrb.mxu1 %v3266_v31  ;;  %v3278_v31 = vld [vmem:[#allocation49_spill] sm:$0xff] }
  0xe0   :  { %1331 = vmatpush.bf16.msra.mxu0 %v3265_v4  ;;  %v3277_v4 = vld [vmem:[#allocation46_spill] sm:$0xff] }
  0xe1   :  { %1368 = vmatpush.bf16.msra.mxu3 %v3277_v4  ;;  %1356 = vmatpush.bf16.msra.mxu2 %v3278_v31 }
  0xe2   :  { %1294 = vmatpush.bf16.msrb.mxu1 %v3268_v12  ;;  %v1229_v12 = vld.sshfl [vmem:[#allocation1 + $0x10] sm:$0xff pattern:$0x73625140] }
  0xe4   :  { %1332 = vmatpush.bf16.msra.mxu0 %v3267_v55 }
  0xe6   :  { %v994_v25 = vpop.f32.mrf.mxu0  ;;  %1295 = vmatpush.bf16.msrb.mxu1 %v3270_v42  ;;  %v2971_v42 = vpack.c.bf16 %v1229_v12, %v1229_v12 }
  0xe7   :  { %v1007_v61 = vpop.f32.mrf.mxu1  ;;  %v995_v41 = vadd.f32 %v994_v25, %v238_v27 }
  0xe8   :  { %1333 = vmatpush.bf16.msra.mxu0 %v3269_v32  ;;  %v3279_v32 = vld [vmem:[#allocation50_spill] sm:$0xff] }
  0xe9   :  { %v1008_v63 = vadd.f32 %v1007_v61, %v995_v41  ;;  %1369 = vmatpush.bf16.msra.mxu3 %v3279_v32  ;;  %1285 = vmatmul.bf16.vlgmr.msrb.gmra.mxu0 %v2971_v42  ;;  %v3286_v41 = vld [vmem:[#allocation61_spill] sm:$0xff]  ;;  %v3288_v32 = vld [vmem:[#allocation55_spill] sm:$0xff] }
  0xea   :  { %1296 = vmatpush.bf16.msrb.mxu1 %v3272_v53 }
  0xec   :  { %1334 = vmatpush.bf16.msra.mxu0 %v3271_v35  ;;  %v3280_v35 = vld [vmem:[#allocation53_spill] sm:$0xff] }
  0xed   :  { %1357 = vmatpush.bf16.msra.mxu2 %v3280_v35  ;;  %v3289_v35 = vld [vmem:[#allocation65_spill] sm:$0xff] }
  0xee   :  { %v1020_v38 = vpop.f32.mrf.mxu2  ;;  %v996_v21 = vpop.f32.mrf.mxu0  ;;  %1297 = vmatpush.bf16.msrb.mxu1 %v3274_v56  ;;  %v3283_v56 = vld [vmem:[#allocation57_spill] sm:$0xff] }
  0xef   :  { %v1033_v10 = vpop.f32.mrf.mxu3  ;;  %v1009_v39 = vpop.f32.mrf.mxu1  ;;  %v1021_v55 = vadd.f32 %v1020_v38, %v1008_v63  ;;  %v3281_v21 = vld [vmem:[#allocation54_spill] sm:$0xff] }
  0xf0   :  { %1335 = vmatpush.bf16.msra.mxu0 %v3273_v45  ;;  %1370 = vmatpush.bf16.msra.mxu3 %v3281_v21  ;;  %v3282_v39 = vld [vmem:[#allocation47_spill] sm:$0xff]  ;;  %v1231_v45 = vld.sshfl [vmem:[#allocation1 + $0x20] sm:$0xff pattern:$0x73625140] }
  0xf1   :  { %v1034_v25 = vadd.f32 %v1033_v10, %v1021_v55  ;;  %1358 = vmatpush.bf16.msra.mxu2 %v3283_v56  ;;  %v3285_v10 = vld [vmem:[#allocation51_spill] sm:$0xff]  ;;  %v3287_v55 = vld [vmem:[#allocation62_spill] sm:$0xff]  ;;  %v3292_v56 = vld [vmem:[#allocation69_spill] sm:$0xff] }
  0xf2   :  { %v1233_v21 = vld.sshfl [vmem:[#allocation1 + $0x30] sm:$0xff pattern:$0x73625140] }
  0xf4   :  { %1336 = vmatpush.bf16.msra.mxu0 %v3275_v60  ;;  %v3284_v60 = vld [vmem:[#allocation58_spill] sm:$0xff] }
  0xf5   :  { %1371 = vmatpush.bf16.msra.mxu3 %v3284_v60  ;;  %1359 = vmatpush.bf16.msra.mxu2 %v3286_v41  ;;  %v3294_v41 = vld [vmem:[#allocation27_spill] sm:$0xff] }
  0xf6   :  { %v1022_v51 = vpop.f32.mrf.mxu2 }
  0xf7   :  { %v1035_v19 = vpop.f32.mrf.mxu3  ;;  %v2978_v51 = vpack.c.bf16 %v1231_v45, %v1231_v45  ;;  %v2991_v45 = vpack.c.bf16 %v1233_v21, %v1233_v21  ;;  %v3314_v21 = vld [vmem:[#allocation44_spill] sm:$0xff] }
  0xf8   :  { %1381 = vmatpush.bf16.msrb.mxu0 %v3282_v39  ;;  %v2982_v19 = vpack.c.bf16 %v1232_v59, %v1232_v59  ;;  %v3290_v39 = vld [vmem:[#allocation66_spill] sm:$0xff] }
  0xf9   :  { %1311 = vmatmul.bf16.vlgmr.msrb.gmra.mxu2 %v2978_v51  ;;  %1372 = vmatpush.bf16.msra.mxu3 %v3287_v55  ;;  %v3309_v55 = vld [vmem:[#allocation78_spill] sm:$0xff] }
  0xfa   :  { %1324 = vmatmul.bf16.vlgmr.msrb.gmra.mxu3 %v2982_v19  ;;  %1360 = vmatpush.bf16.msra.mxu2 %v3289_v35  ;;  %v1234_v35 = vld.sshfl [vmem:[#allocation1 + $0x38] sm:$0xff pattern:$0x73625140] }
  0xfb   :  { %1337 = vmatmul.bf16.vlgmr.msra.gmra.mxu0 %v2991_v45 }
  0xfc   :  { %1382 = vmatpush.bf16.msrb.mxu0 %v3285_v10  ;;  %v3293_v10 = vld [vmem:[#allocation70_spill] sm:$0xff] }
  0xfd   :  { %1373 = vmatpush.bf16.msra.mxu3 %v3290_v39  ;;  %v3315_v39 = vld [vmem:[#allocation48_spill] sm:$0xff] }
  0xfe   :  { %1361 = vmatpush.bf16.msra.mxu2 %v3292_v56  ;;  %v3317_v56 = vld [vmem:[#allocation52_spill] sm:$0xff] }
 0x100   :  { %1383 = vmatpush.bf16.msrb.mxu0 %v3288_v32  ;;  %v3311_v32 = vld [vmem:[#allocation40_spill] sm:$0xff] }
 0x101   :  { %1374 = vmatpush.bf16.msra.mxu3 %v3293_v10 }
 0x102   :  { %1362 = vmatpush.bf16.msra.mxu2 %v2685_v18  ;;  %v3299_v18 = vld [vmem:[#allocation33_spill] sm:$0xff] }
 0x105   :  { %1375 = vmatpush.bf16.msra.mxu3 %v2689_v28  ;;  %v3300_v28 = vld [vmem:[#allocation77_spill] sm:$0xff] }
 0x106   :  { %v1046_v53 = vpop.f32.mrf.mxu0  ;;  %1407 = vmatpush.bf16.msrb.mxu2 %v2696_v48 }
 0x107   :  { %v1059_v61 = vpop.f32.mrf.mxu1  ;;  %v1047_v38 = vadd.f32 %v1046_v53, %v1034_v25 }
 0x109   :  { %v1060_v49 = vadd.f32 %v1059_v61, %v1047_v38  ;;  %v3291_v61 = vld [vmem:[#allocation59_spill] sm:$0xff]  ;;  %1420 = vmatpush.bf16.msrb.mxu3 %v2698_v46  ;;  %1363 = vmatmul.bf16.vlgmr.msra.gmra.mxu2 %v1243_v20  ;;  %v3301_v46 = vld [vmem:[#allocation73_spill] sm:$0xff] }
 0x10a   :  { %1384 = vmatpush.bf16.msrb.mxu0 %v3291_v61  ;;  %1408 = vmatpush.bf16.msrb.mxu2 %v2709_v11  ;;  %v3302_v11 = vld [vmem:[#allocation80_spill] sm:$0xff]  ;;  %v3303_v20 = vld [vmem:[#allocation35_spill] sm:$0xff]  ;;  %v3316_v61 = vld [vmem:[#allocation86_spill] sm:$0xff] }
 0x10b   :  { %1376 = vmatmul.bf16.vlgmr.msra.gmra.mxu3 %v1244_v24  ;;  %v3307_v24 = vld [vmem:[#allocation37_spill] sm:$0xff] }
 0x10d   :  { %1421 = vmatpush.bf16.msrb.mxu3 %v2713_v52  ;;  %v3305_v52 = vld [vmem:[#allocation75_spill] sm:$0xff] }
 0x10e   :  { %v1072_v26 = vpop.f32.mrf.mxu2  ;;  %v1048_v31 = vpop.f32.mrf.mxu0  ;;  %1409 = vmatpush.bf16.msrb.mxu2 %v2724_v50  ;;  %v3306_v50 = vld [vmem:[#allocation84_spill] sm:$0xff] }
 0x10f   :  { %v1073_v63 = vadd.f32 %v1072_v26, %v1060_v49  ;;  %v1085_v4 = vpop.f32.mrf.mxu3  ;;  %v1061_v12 = vpop.f32.mrf.mxu1  ;;  %v3295_v49 = vld [vmem:[#allocation63_spill] sm:$0xff]  ;;  %v3296_v26 = vld [vmem:[#allocation29_spill] sm:$0xff] }
 0x110   :  { %1385 = vmatpush.bf16.msrb.mxu0 %v3295_v49  ;;  %v1230_v31 = vld.sshfl [vmem:[#allocation1 + $0x18] sm:$0xff pattern:$0x73625140] }
 0x111   :  { %v1086_v25 = vadd.f32 %v1085_v4, %v1073_v63  ;;  %v3297_v63 = vld [vmem:[#allocation67_spill] sm:$0xff]  ;;  %v1246_v48 = vpack.c.bf16 %v1230_v31, %v1230_v31  ;;  %1422 = vmatpush.bf16.msrb.mxu3 %v3300_v28  ;;  %v3310_v12 = vld [vmem:[#allocation88_spill] sm:$0xff] }
 0x112   :  { %v3298_v4 = vld [vmem:[#allocation31_spill] sm:$0xff]  ;;  %1410 = vmatpush.bf16.msrb.mxu2 %v3302_v11 }
 0x113   :  { %v1090_v53 = vmax.f32 %v1086_v25, 0.0  ;;  %v3313_v25 = vld [vmem:[#allocation82_spill] sm:$0xff] }
 0x114   :  { %1386 = vmatpush.bf16.msrb.mxu0 %v3297_v63 }
 0x115   :  { %v1092_v38 = vpack.c.bf16 %v1090_v53, %v1090_v53  ;;  %v1250_v53 = vpack.c.bf16 %v1234_v35, %v1234_v35 }
 0x116   :  { %v1074_v59 = vpop.f32.mrf.mxu2  ;;  %1411 = vmatpush.bf16.msrb.mxu2 %v3306_v50 }
 0x117   :  { %v1087_v60 = vpop.f32.mrf.mxu3  ;;  %1213 = vmatmul.bf16.vlgmr.msra.gmra.mxu1 %v1092_v38 }
 0x118   :  { %1342 = vmatpush.bf16.msra.mxu1 %v3294_v41  ;;  %1387 = vmatpush.bf16.msrb.mxu0 %v2679_v40  ;;  %v3304_v40 = vld [vmem:[#allocation81_spill] sm:$0xff] }
 0x119   :  { %1423 = vmatpush.bf16.msrb.mxu3 %v3304_v40 }
 0x11a   :  { %1412 = vmatpush.bf16.msrb.mxu2 %v3310_v12 }
 0x11c   :  { %1343 = vmatpush.bf16.msra.mxu1 %v3296_v26  ;;  %1388 = vmatpush.bf16.msrb.mxu0 %v2691_v1  ;;  %v3308_v1 = vld [vmem:[#allocation85_spill] sm:$0xff] }
 0x11d   :  { %1424 = vmatpush.bf16.msrb.mxu3 %v3308_v1 }
 0x11e   :  { %1413 = vmatpush.bf16.msrb.mxu2 %v2773_v34  ;;  %v3318_v34 = vld [vmem:[#allocation56_spill] sm:$0xff] }
 0x11f   :  { %1389 = vmatmul.bf16.vlgmr.msrb.gmra.mxu0 %v2971_v42  ;;  %v3312_v42 = vld [vmem:[#allocation89_spill] sm:$0xff] }
 0x120   :  { %1344 = vmatpush.bf16.msra.mxu1 %v3298_v4  ;;  %1433 = vmatpush.bf16.msra.mxu0 %v3301_v46 }
 0x121   :  { %1425 = vmatpush.bf16.msrb.mxu3 %v3312_v42 }
 0x122   :  { %1414 = vmatpush.bf16.msrb.mxu2 %v2785_v37  ;;  %v3319_v37 = vld [vmem:[#allocation60_spill] sm:$0xff] }
 0x124   :  { %1345 = vmatpush.bf16.msra.mxu1 %v3299_v18  ;;  %1434 = vmatpush.bf16.msra.mxu0 %v3305_v52 }
 0x125   :  { %1426 = vmatpush.bf16.msrb.mxu3 %v2777_v9  ;;  %1415 = vmatmul.bf16.vlgmr.msrb.gmra.mxu2 %v2978_v51  ;;  %v3321_v9 = vld [vmem:[#allocation68_spill] sm:$0xff] }
 0x126   :  { %1463 = vmatpush.bf16.msra.mxu2 %v2799_v13  ;;  %v3325_v13 = vld [vmem:[#allocation76_spill] sm:$0xff] }
 0x127   :  { %1298 = vmatmul.bf16.vlgmr.msrb.gmra.mxu1 %v1246_v48 }
 0x128   :  { %1346 = vmatpush.bf16.msra.mxu1 %v3303_v20  ;;  %1435 = vmatpush.bf16.msra.mxu0 %v3309_v55 }
 0x129   :  { %1427 = vmatpush.bf16.msrb.mxu3 %v2789_v30  ;;  %v3323_v30 = vld [vmem:[#allocation72_spill] sm:$0xff] }
 0x12a   :  { %1464 = vmatpush.bf16.msra.mxu2 %v2821_v3 }
 0x12c   :  { %1347 = vmatpush.bf16.msra.mxu1 %v3307_v24  ;;  %1436 = vmatpush.bf16.msra.mxu0 %v3313_v25 }
 0x12d   :  { %1476 = vmatpush.bf16.msra.mxu3 %v2887_v6 }
 0x12e   :  { %1428 = vmatmul.bf16.vlgmr.msrb.gmra.mxu3 %v2982_v19  ;;  %1465 = vmatpush.bf16.msra.mxu2 %v2830_v7  ;;  %v3326_v7 = vld [vmem:[#allocation79_spill] sm:$0xff] }
 0x130   :  { %1348 = vmatpush.bf16.msra.mxu1 %v3311_v32  ;;  %1437 = vmatpush.bf16.msra.mxu0 %v3316_v61 }
 0x131   :  { %1477 = vmatpush.bf16.msra.mxu3 %v2895_v43 }
 0x132   :  { %1466 = vmatpush.bf16.msra.mxu2 %v2836_v16  ;;  %v3327_v16 = vld [vmem:[#allocation83_spill] sm:$0xff] }
 0x134   :  { %1349 = vmatpush.bf16.msra.mxu1 %v3314_v21  ;;  %1438 = vmatpush.bf16.msra.mxu0 %v2767_v54  ;;  %v3320_v54 = vld [vmem:[#allocation64_spill] sm:$0xff] }
 0x135   :  { %1478 = vmatpush.bf16.msra.mxu3 %v2906_v8 }
 0x136   :  { %1467 = vmatpush.bf16.msra.mxu2 %v2844_v17 }
 0x137   :  { %1350 = vmatmul.bf16.vlgmr.msra.gmra.mxu1 %v1250_v53 }
 0x138   :  { %1394 = vmatpush.bf16.msrb.mxu1 %v3315_v39  ;;  %1439 = vmatpush.bf16.msra.mxu0 %v2779_v47  ;;  %v3322_v47 = vld [vmem:[#allocation71_spill] sm:$0xff] }
 0x139   :  { %1479 = vmatpush.bf16.msra.mxu3 %v2915_v0 }
 0x13a   :  { %1468 = vmatpush.bf16.msra.mxu2 %v2858_v29  ;;  %v3328_v29 = vld [vmem:[#allocation87_spill] sm:$0xff] }
 0x13c   :  { %1395 = vmatpush.bf16.msrb.mxu1 %v3317_v56  ;;  %1440 = vmatpush.bf16.msra.mxu0 %v2791_v58  ;;  %v3324_v58 = vld [vmem:[#allocation74_spill] sm:$0xff] }
 0x13d   :  { %1480 = vmatpush.bf16.msra.mxu3 %v2923_v36 }
 0x13e   :  { %1469 = vmatpush.bf16.msra.mxu2 %v2866_v33 }
 0x13f   :  { %1441 = vmatmul.bf16.vlgmr.msra.gmra.mxu0 %v2991_v45 }
 0x140   :  { %1396 = vmatpush.bf16.msrb.mxu1 %v3318_v34 }
 0x141   :  { %1481 = vmatpush.bf16.msra.mxu3 %v2930_v15  ;;  %v2249_v15 = vld [vmem:[%s3089_s5] ss:$0 sm:$0xff]  ;;  %s2331_s5 = smov [#allocation5]  }
 0x142   :  { %1470 = vmatpush.bf16.msra.mxu2 %v2879_v57  ;;  %s1496_s21 = sshll.u32 %s2331_s5, 4  ;;  %s1497_s21 = int_to_ptr.vmem [resolvable:$true] %s1496_s21 }
 0x144   :  { %1397 = vmatpush.bf16.msrb.mxu1 %v3319_v37 }
 0x145   :  { %1482 = vmatpush.bf16.msra.mxu3 %v2937_v2 }
 0x148   :  { %1398 = vmatpush.bf16.msrb.mxu1 %v3320_v54 }
 0x149   :  { %1483 = vmatpush.bf16.msra.mxu3 %v2944_v23 }
 0x14c   :  { %1399 = vmatpush.bf16.msrb.mxu1 %v3321_v9 }
 0x150   :  { %1400 = vmatpush.bf16.msrb.mxu1 %v3322_v47 }
 0x154   :  { %1401 = vmatpush.bf16.msrb.mxu1 %v3323_v30  ;;  %v1201_v3 = vpop.f32.mrf.mxu0 }
 0x155   :  { %v1202_v23 = vadd.f32 %v2249_v15, %v1201_v3 }
 0x157   :  { %1402 = vmatmul.bf16.vlgmr.msrb.gmra.mxu1 %v1246_v48 }
 0x158   :  { %1446 = vmatpush.bf16.msra.mxu1 %v3324_v58  ;;  %v1260_v33 = vpop.f32.mrf.mxu2 }
 0x15c   :  { %1447 = vmatpush.bf16.msra.mxu1 %v3325_v13  ;;  %v1203_v17 = vpop.f32.mrf.mxu0 }
 0x15e   :  { %v1273_v57 = vpop.f32.mrf.mxu3 }
 0x160   :  { %1448 = vmatpush.bf16.msra.mxu1 %v3326_v7  ;;  %v1262_v43 = vpop.f32.mrf.mxu2 }
 0x164   :  { %1449 = vmatpush.bf16.msra.mxu1 %v3327_v16 }
 0x166   :  { %v1286_v6 = vpop.f32.mrf.mxu0  ;;  %v1275_v8 = vpop.f32.mrf.mxu3 }
 0x168   :  { %1450 = vmatpush.bf16.msra.mxu1 %v3328_v29 }
 0x16c   :  { %1451 = vmatpush.bf16.msra.mxu1 %v2770_v14 }
 0x16e   :  { %v1288_v0 = vpop.f32.mrf.mxu0 }
 0x170   :  { %1452 = vmatpush.bf16.msra.mxu1 %v2782_v62 }
 0x174   :  { %1453 = vmatpush.bf16.msra.mxu1 %v2794_v22  ;;  %v1261_v22 = vadd.f32 %v1260_v33, %v237_v5 }
 0x176   :  { %v1274_v10 = vadd.f32 %v1273_v57, %v1261_v22 }
 0x177   :  { %1454 = vmatmul.bf16.vlgmr.msra.gmra.mxu1 %v1250_v53 }
 0x178   :  { %v1338_v51 = vpop.f32.mrf.mxu0  ;;  %v1287_v49 = vadd.f32 %v1286_v6, %v1274_v10 }
 0x17c   :  { %v1312_v36 = vpop.f32.mrf.mxu2 }
 0x17d   :  { %v1325_v2 = vpop.f32.mrf.mxu3 }
 0x180   :  { %v1340_v59 = vpop.f32.mrf.mxu0 }
 0x184   :  { %v1314_v62 = vpop.f32.mrf.mxu2 }
 0x185   :  { %v1327_v38 = vpop.f32.mrf.mxu3 }
 0x18c   :  { %v1364_v41 = vpop.f32.mrf.mxu2 }
 0x18d   :  { %v1365_v26 = vadd.f32 %v1364_v41, %v238_v27 }
 0x18e   :  { %v1377_v63 = vpop.f32.mrf.mxu3 }
 0x18f   :  { %v1378_v4 = vadd.f32 %v1377_v63, %v1365_v26 }
 0x194   :  { %v1214_v14 = vpop.f32.mrf.mxu1  ;;  %v1366_v46 = vpop.f32.mrf.mxu2 }
 0x195   :  { %v1215_v19 = vadd.f32 %v1214_v14, %v1202_v23 }
 0x196   :  { %v1379_v20 = vpop.f32.mrf.mxu3 }
 0x197   :  { %v1218_v45 = vpack.c.bf16 %v1215_v19, %v1215_v19 }
 0x199   :  { %1219 = vst [vmem:[#allocation5] sm:$0x1] %v1218_v45 }
 0x19a   :  { %1501 = dma.vmem_to_hbm [thread:$0]  %s1497_s21, 16, %s1499_s24, [#allocation4]  }
 0x19c   :  { %v1216_v60 = vpop.f32.mrf.mxu1  ;;  %v1390_v48 = vpop.f32.mrf.mxu0 }
 0x19d   :  { %v1391_v28 = vadd.f32 %v1390_v48, %v1378_v4 }
 0x1a4   :  { %v1299_v31 = vpop.f32.mrf.mxu1  ;;  %v1392_v5 = vpop.f32.mrf.mxu0 }
 0x1a5   :  { %v1300_v18 = vadd.f32 %v1299_v31, %v1287_v49 }
 0x1a7   :  { %v1313_v11 = vadd.f32 %v1312_v36, %v1300_v18 }
 0x1a8   :  { %v1416_v27 = vpop.f32.mrf.mxu2 }
 0x1a9   :  { %v1326_v52 = vadd.f32 %v1325_v2, %v1313_v11 }
 0x1ab   :  { %v1339_v50 = vadd.f32 %v1338_v51, %v1326_v52 }
 0x1ac   :  { %v1301_v40 = vpop.f32.mrf.mxu1 }
 0x1b0   :  { %v1418_v42 = vpop.f32.mrf.mxu2 }
 0x1b1   :  { %v1429_v32 = vpop.f32.mrf.mxu3 }
 0x1b4   :  { %v1351_v24 = vpop.f32.mrf.mxu1 }
 0x1b5   :  { %v1352_v1 = vadd.f32 %v1351_v24, %v1339_v50 }
 0x1b7   :  { %v1459_v55 = vmax.f32 %v1352_v1, 0.0 }
 0x1b9   :  { %v1461_v12 = vpack.c.bf16 %v1459_v55, %v1459_v55  ;;  %v1431_v25 = vpop.f32.mrf.mxu3 }
 0x1bb   :  { %1471 = vmatmul.bf16.vlgmr.msra.gmra.mxu2 %v1461_v12 }
 0x1bc   :  { %v1353_v44 = vpop.f32.mrf.mxu1  ;;  %v1442_v35 = vpop.f32.mrf.mxu0 }
 0x1c4   :  { %v1444_v53 = vpop.f32.mrf.mxu0 }
 0x1d4   :  { %v1403_v21 = vpop.f32.mrf.mxu1 }
 0x1d5   :  { %v1404_v61 = vadd.f32 %v1403_v21, %v1391_v28 }
 0x1d7   :  { %v1417_v56 = vadd.f32 %v1416_v27, %v1404_v61 }
 0x1d9   :  { %v1430_v34 = vadd.f32 %v1429_v32, %v1417_v56 }
 0x1db   :  { %v1443_v37 = vadd.f32 %v1442_v35, %v1430_v34 }
 0x1dc   :  { %v1405_v39 = vpop.f32.mrf.mxu1 }
 0x1f4   :  { %v1455_v54 = vpop.f32.mrf.mxu1 }
 0x1f5   :  { %v1456_v9 = vadd.f32 %v1455_v54, %v1443_v37 }
 0x1f7   :  { %v1460_v47 = vmax.f32 %v1456_v9, 0.0 }
 0x1f9   :  { %v1462_v30 = vpack.c.bf16 %v1460_v47, %v1460_v47 }
 0x1fb   :  { %1484 = vmatmul.bf16.vlgmr.msra.gmra.mxu3 %v1462_v30 }
 0x1fc   :  { %v1457_v58 = vpop.f32.mrf.mxu1 }
 0x23e   :  { %v1472_v13 = vpop.f32.mrf.mxu2 }
 0x23f   :  { %v1473_v7 = vadd.f32 %v2249_v15, %v1472_v13 }
 0x246   :  { %v1474_v3 = vpop.f32.mrf.mxu2 }
 0x27e   :  { %v1485_v16 = vpop.f32.mrf.mxu3 }
 0x27f   :  { %v1486_v17 = vadd.f32 %v1485_v16, %v1473_v7 }
 0x281   :  { %v1489_v29 = vpack.c.bf16 %v1486_v17, %v1486_v17 }
 0x283   :  { %1490 = vst [vmem:[#allocation6] sm:$0x1] %v1489_v29 }
 0x284   :  { %1512 = dma.vmem_to_hbm [thread:$0]  %s1508_s26, 16, %s1510_s29, [#allocation7]  }
 0x286   :  { %v1487_v33 = vpop.f32.mrf.mxu3 }
 0x287   :  { %2324 = dma.done.wait [#allocation4], 16  }
 0x288   :  { %2325 = vsyncadd [#allocation4], 4294967280 }
 0x289   :  { %2326 = dma.done.wait [#allocation7], 16  }
 0x28a   :  { %2327 = vsyncadd [#allocation7], 4294967280 }
 0x28b   :  { %1521 = vsyncpa [#allocation3], 1 }
 0x28c   :  { %1522 = vsyncpa [#allocation4], 1 }
 0x28d   :  { %1523 = vsyncpa [#allocation7], 1 }

</bundles_post_ra>
